<compile_context>
chip_gen: v5e
topology: v5e:2x2
jax: 0.10.0
libtpu: 0.0.40
codegen_flags: <defaults>
</compile_context>

<pallas_src>
import functools
import math

import jax
import jax.numpy as jnp
import numpy as np
from jax.experimental import pallas as pl
from jax.experimental.pallas import tpu as pltpu


def _ln(x, g, b, eps=1e-5):
    mu = jnp.mean(x, axis=-1, keepdims=True)
    var = jnp.mean(jnp.square(x - mu), axis=-1, keepdims=True)
    return (x - mu) * jax.lax.rsqrt(var + eps) * g + b


def vit_kernel(feat_ref, pos_ref,
               proj_w_ref, proj_b_ref,
               ln1_g_ref, ln1_b_ref,
               wqkv_ref, bqkv_ref, wo_ref, bo_ref,
               ln2_g_ref, ln2_b_ref,
               w1_ref, b1_ref, w2_ref, b2_ref,
               lnf_g_ref, lnf_b_ref,
               wh_ref, bh_ref,
               out_ref,
               o_scratch, pooled_ref,
               *, num_layers, num_heads, head_dim, inv_wp):
    f32 = jnp.float32
    bf16 = jnp.bfloat16
    D = num_heads * head_dim
    w = pl.program_id(0)

    @pl.when(w == 0)
    def _():
        pooled_ref[...] = jnp.zeros_like(pooled_ref)

    # --- PatchEncoder for this w-slice: (B, CH) @ (CH, D) + bias + pos[w] ---
    x = (jnp.dot(feat_ref[...], proj_w_ref[...], preferred_element_type=f32)
         + proj_b_ref[...] + pos_ref[...])                       # (B, D) f32

    def layer_body(_, x):
        # ---------- Attention: LN -> fused QKV -> per-head softmax ----------
        y = _ln(x, ln1_g_ref[...], ln1_b_ref[...])
        qkv = (jnp.dot(y.astype(bf16), wqkv_ref[...],
                       preferred_element_type=f32)
               + bqkv_ref[...])                                  # (B, 3D); q pre-scaled
        for h in range(num_heads):
            lo = h * head_dim
            qh = qkv[:, lo:lo + head_dim]
            kh = qkv[:, D + lo:D + lo + head_dim]
            vh = qkv[:, 2 * D + lo:2 * D + lo + head_dim]
            s = jax.lax.dot_general(qh, kh, (((1,), (1,)), ((), ())),
                                    preferred_element_type=f32)  # (B, B)
            s = s - jnp.max(s, axis=-1, keepdims=True)
            p = jnp.exp(s)
            p = p * pl.reciprocal(jnp.sum(p, axis=-1, keepdims=True),
                                  approx=True)
            oh = jnp.dot(p.astype(bf16), vh.astype(bf16),
                         preferred_element_type=f32)             # (B, Hd)
            o_scratch[:, lo:lo + head_dim] = oh
        x = x + (jnp.dot(o_scratch[...].astype(bf16), wo_ref[...],
                         preferred_element_type=f32) + bo_ref[...])
        # ---------- MLP: LN -> Linear -> Linear (dropouts = identity) -------
        y = _ln(x, ln2_g_ref[...], ln2_b_ref[...])
        h1 = (jnp.dot(y.astype(bf16), w1_ref[...], preferred_element_type=f32)
              + b1_ref[...])
        x = x + (jnp.dot(h1.astype(bf16), w2_ref[...],
                         preferred_element_type=f32) + b2_ref[...])
        return x

    x = jax.lax.fori_loop(0, num_layers, layer_body, x)

    # final LayerNorm, accumulate toward the mean over patches (w axis)
    pooled_ref[...] += _ln(x, lnf_g_ref[...], lnf_b_ref[...])

    @pl.when(w == pl.num_programs(0) - 1)
    def _():
        pooled = pooled_ref[...] * inv_wp                        # mean over w
        out_ref[...] = (jnp.dot(pooled.astype(bf16), wh_ref[...],
                                preferred_element_type=f32) + bh_ref[...])


def vit_forward(feature, p, *, num_layers, num_heads):
    """feature: backbone output, NCHW (b, c, h, w)."""
    B, C, Hh, Ww = feature.shape
    Wp = Ww                       # num_patches
    CH = Hh * C                   # channel_dim
    D = p['proj_w'].shape[0]
    Hd = D // num_heads
    n_cls = p['head_w'].shape[0]
    NCLS_PAD = max(128, ((n_cls + 127) // 128) * 128)   # lane-dense output slab

    f32 = jnp.float32
    bf16 = jnp.bfloat16

    # torch `view(b, w, h*c)` on a contiguous NCHW tensor == row-major reshape.
    feat_bwc = feature.reshape(B, Wp, CH)
    feat_wbc = jnp.transpose(feat_bwc, (1, 0, 2)).astype(bf16)    # (Wp, B, CH)

    pos = p['pos'].reshape(Wp, 1, D).astype(f32)                  # (Wp, 1, D)

    # Fuse QKV; fold the 1/sqrt(head_dim) scale into the Q weights/bias.
    scale = 1.0 / math.sqrt(Hd)
    Wq, Wk, Wv = jnp.split(p['in_w'], 3, axis=0)                  # each (D, D)
    bq, bk, bv = jnp.split(p['in_b'], 3, axis=0)
    wqkv = jnp.concatenate([Wq.T * scale, Wk.T, Wv.T], axis=1).astype(bf16)
    bqkv = jnp.concatenate([bq * scale, bk, bv])[None, :].astype(f32)

    # Classifier padded to a lane-dense 128-wide slab (zeros beyond n_cls).
    wh = jnp.zeros((D, NCLS_PAD), f32).at[:, :n_cls].set(p['head_w'].T)
    wh = wh.astype(bf16)
    bh = jnp.zeros((1, NCLS_PAD), f32).at[0, :n_cls].set(p['head_b'])

    args = (feat_wbc, pos,
            p['proj_w'].T.astype(bf16), p['proj_b'][None, :].astype(f32),
            p['ln1_g'][None, :], p['ln1_b'][None, :],
            wqkv, bqkv,
            p['out_w'].T.astype(bf16), p['out_b'][None, :].astype(f32),
            p['ln2_g'][None, :], p['ln2_b'][None, :],
            p['w1'].T.astype(bf16), p['b1'][None, :].astype(f32),
            p['w2'].T.astype(bf16), p['b2'][None, :].astype(f32),
            p['lnf_g'][None, :], p['lnf_b'][None, :],
            wh, bh)

    vmem_full = pl.BlockSpec(memory_space=pltpu.MemorySpace.VMEM)
    in_specs = [
        pl.BlockSpec((None, B, CH), lambda w: (w, 0, 0)),   # feat: one w-slice
        pl.BlockSpec((None, 1, D), lambda w: (w, 0, 0)),    # pos[w]
    ] + [vmem_full] * (len(args) - 2)                       # weights: resident

    kernel = functools.partial(vit_kernel, num_layers=num_layers,
                               num_heads=num_heads, head_dim=Hd,
                               inv_wp=1.0 / Wp)

    out_pad = pl.pallas_call(
        kernel,
        out_shape=jax.ShapeDtypeStruct((B, NCLS_PAD), f32),
        grid_spec=pltpu.PrefetchScalarGridSpec(
            num_scalar_prefetch=0,
            grid=(Wp,),
            in_specs=in_specs,
            out_specs=pl.BlockSpec((B, NCLS_PAD), lambda w: (0, 0)),
            scratch_shapes=[pltpu.VMEM((B, D), f32),    # per-head attn concat
                            pltpu.VMEM((B, D), f32)]),  # pooled-mean accumulator
        compiler_params=pltpu.CompilerParams(
            dimension_semantics=("arbitrary",)),        # pooled carried across w
    )(*args)
    return out_pad[:, :n_cls]


def reference_forward(feature, p, *, num_layers, num_heads):
    """Pure-JAX (f32) mirror of the PyTorch forward (eval mode)."""
    B, C, Hh, Ww = feature.shape
    x = feature.reshape(B, Ww, Hh * C)
    D = p['proj_w'].shape[0]
    Hd = D // num_heads
    x = x @ p['proj_w'].T + p['proj_b'] + p['pos']                # (B, W, D)
    for _ in range(num_layers):
        y = _ln(x, p['ln1_g'], p['ln1_b'])
        qkv = y @ p['in_w'].T + p['in_b']
        q, k, v = jnp.split(qkv, 3, axis=-1)
        q = (q / jnp.sqrt(jnp.float32(Hd))).reshape(B, Ww, num_heads, Hd)
        k = k.reshape(B, Ww, num_heads, Hd)
        v = v.reshape(B, Ww, num_heads, Hd)
        # nn.MultiheadAttention (batch_first=False): seq axis is dim 0 (= b)
        s = jnp.einsum('bwhd,cwhd->whbc', q, k)
        pattn = jax.nn.softmax(s, axis=-1)
        o = jnp.einsum('whbc,cwhd->bwhd', pattn, v).reshape(B, Ww, D)
        x = x + o @ p['out_w'].T + p['out_b']
        y = _ln(x, p['ln2_g'], p['ln2_b'])
        x = x + (y @ p['w1'].T + p['b1']) @ p['w2'].T + p['b2']
    y = _ln(x, p['lnf_g'], p['lnf_b'])
    m = y.mean(axis=1)
    return m @ p['head_w'].T + p['head_b']


if __name__ == "__main__":
    # small shapes: backbone feature (b, c, h, w) = (2, 4, 4, 8)
    B, C, Hh, Ww = 2, 4, 4, 8
    D, HID, HEADS, LAYERS, NCLS = 32, 64, 4, 2, 10
    CH = Hh * C

    key = jax.random.PRNGKey(0)
    ks = jax.random.split(key, 16)
    s = 0.05

    def nrm(k, shape):
        return s * jax.random.normal(k, shape, dtype=jnp.float32)

    params = {
        'proj_w': nrm(ks[0], (D, CH)), 'proj_b': nrm(ks[1], (D,)),
        'pos':    nrm(ks[2], (Ww, D)),
        'ln1_g': jnp.ones((D,), jnp.float32), 'ln1_b': jnp.zeros((D,), jnp.float32),
        'in_w':  nrm(ks[3], (3 * D, D)), 'in_b': nrm(ks[4], (3 * D,)),
        'out_w': nrm(ks[5], (D, D)),     'out_b': nrm(ks[6], (D,)),
        'ln2_g': jnp.ones((D,), jnp.float32), 'ln2_b': jnp.zeros((D,), jnp.float32),
        'w1': nrm(ks[7], (HID, D)), 'b1': nrm(ks[8], (HID,)),
        'w2': nrm(ks[9], (D, HID)), 'b2': nrm(ks[10], (D,)),
        'lnf_g': jnp.ones((D,), jnp.float32), 'lnf_b': jnp.zeros((D,), jnp.float32),
        'head_w': nrm(ks[11], (NCLS, D)), 'head_b': nrm(ks[12], (NCLS,)),
    }

    # TODO(synk): backbone feature extractor not implemented; this IS its output.
    feat = jax.random.normal(ks[13], (B, C, Hh, Ww), dtype=jnp.float32)

    out = vit_forward(feat, params, num_layers=LAYERS, num_heads=HEADS)
    out = jax.block_until_ready(out)

    ref = reference_forward(feat, params, num_layers=LAYERS, num_heads=HEADS)
    # bf16 MXU operands (f32 accumulation) -> slightly looser tolerance than f32.
    np.testing.assert_allclose(np.asarray(out), np.asarray(ref),
                               rtol=2e-2, atol=2e-2)
    print("KERNEL_OK")
</pallas_src>

<mosaic_0001>
module attributes {stable_mosaic.version = 11 : i64} {
  func.func @vit_kernel(%arg0: i32, %arg1: memref<1x2x16xbf16, #tpu.memory_space<vmem>>, %arg2: memref<1x1x32xf32, #tpu.memory_space<vmem>>, %arg3: memref<16x32xbf16, #tpu.memory_space<vmem>>, %arg4: memref<1x32xf32, #tpu.memory_space<vmem>>, %arg5: memref<1x32xf32, #tpu.memory_space<vmem>>, %arg6: memref<1x32xf32, #tpu.memory_space<vmem>>, %arg7: memref<32x96xbf16, #tpu.memory_space<vmem>>, %arg8: memref<1x96xf32, #tpu.memory_space<vmem>>, %arg9: memref<32x32xbf16, #tpu.memory_space<vmem>>, %arg10: memref<1x32xf32, #tpu.memory_space<vmem>>, %arg11: memref<1x32xf32, #tpu.memory_space<vmem>>, %arg12: memref<1x32xf32, #tpu.memory_space<vmem>>, %arg13: memref<32x64xbf16, #tpu.memory_space<vmem>>, %arg14: memref<1x64xf32, #tpu.memory_space<vmem>>, %arg15: memref<64x32xbf16, #tpu.memory_space<vmem>>, %arg16: memref<1x32xf32, #tpu.memory_space<vmem>>, %arg17: memref<1x32xf32, #tpu.memory_space<vmem>>, %arg18: memref<1x32xf32, #tpu.memory_space<vmem>>, %arg19: memref<32x128xbf16, #tpu.memory_space<vmem>>, %arg20: memref<1x128xf32, #tpu.memory_space<vmem>>, %arg21: memref<2x128xf32, #tpu.memory_space<vmem>>, %arg22: memref<2x32xf32, #tpu.memory_space<vmem>>, %arg23: memref<2x32xf32, #tpu.memory_space<vmem>>) attributes {dimension_semantics = [#tpu.dimension_semantics<arbitrary>], iteration_bounds = array<i64: 8>, scalar_prefetch = 0 : i64, scratch_operands = 2 : i64, tpu.core_type = #tpu.core_type<tc>, window_params = [{transform_indices = @transform_0, window_bounds = array<i64: 1, 2, 16>}, {transform_indices = @transform_1, window_bounds = array<i64: 1, 1, 32>}, {pipeline_mode = #tpu.pipeline_mode<synchronous>, transform_indices = @transform_2, window_bounds = array<i64: 16, 32>}, {pipeline_mode = #tpu.pipeline_mode<synchronous>, transform_indices = @transform_3, window_bounds = array<i64: 1, 32>}, {pipeline_mode = #tpu.pipeline_mode<synchronous>, transform_indices = @transform_4, window_bounds = array<i64: 1, 32>}, {pipeline_mode = #tpu.pipeline_mode<synchronous>, transform_indices = @transform_5, window_bounds = array<i64: 1, 32>}, {pipeline_mode = #tpu.pipeline_mode<synchronous>, transform_indices = @transform_6, window_bounds = array<i64: 32, 96>}, {pipeline_mode = #tpu.pipeline_mode<synchronous>, transform_indices = @transform_7, window_bounds = array<i64: 1, 96>}, {pipeline_mode = #tpu.pipeline_mode<synchronous>, transform_indices = @transform_8, window_bounds = array<i64: 32, 32>}, {pipeline_mode = #tpu.pipeline_mode<synchronous>, transform_indices = @transform_9, window_bounds = array<i64: 1, 32>}, {pipeline_mode = #tpu.pipeline_mode<synchronous>, transform_indices = @transform_10, window_bounds = array<i64: 1, 32>}, {pipeline_mode = #tpu.pipeline_mode<synchronous>, transform_indices = @transform_11, window_bounds = array<i64: 1, 32>}, {pipeline_mode = #tpu.pipeline_mode<synchronous>, transform_indices = @transform_12, window_bounds = array<i64: 32, 64>}, {pipeline_mode = #tpu.pipeline_mode<synchronous>, transform_indices = @transform_13, window_bounds = array<i64: 1, 64>}, {pipeline_mode = #tpu.pipeline_mode<synchronous>, transform_indices = @transform_14, window_bounds = array<i64: 64, 32>}, {pipeline_mode = #tpu.pipeline_mode<synchronous>, transform_indices = @transform_15, window_bounds = array<i64: 1, 32>}, {pipeline_mode = #tpu.pipeline_mode<synchronous>, transform_indices = @transform_16, window_bounds = array<i64: 1, 32>}, {pipeline_mode = #tpu.pipeline_mode<synchronous>, transform_indices = @transform_17, window_bounds = array<i64: 1, 32>}, {pipeline_mode = #tpu.pipeline_mode<synchronous>, transform_indices = @transform_18, window_bounds = array<i64: 32, 128>}, {pipeline_mode = #tpu.pipeline_mode<synchronous>, transform_indices = @transform_19, window_bounds = array<i64: 1, 128>}, {pipeline_mode = #tpu.pipeline_mode<synchronous>, transform_indices = @transform_20, window_bounds = array<i64: 2, 128>}]} {
    %c0_i32 = arith.constant 0 : i32
    %0 = arith.cmpi eq, %arg0, %c0_i32 : i32
    %1 = arith.extui %0 : i1 to i32
    %c0_i32_0 = arith.constant 0 : i32
    %2 = arith.cmpi ne, %1, %c0_i32_0 : i32
    scf.if %2 {
      %cst_25 = arith.constant 0.000000e+00 : f32
      %46 = vector.broadcast %cst_25 : f32 to vector<2x32xf32>
      %c0_26 = arith.constant 0 : index
      %c0_27 = arith.constant 0 : index
      %47 = vector.load %arg23[%c0_26, %c0_27] : memref<2x32xf32, #tpu.memory_space<vmem>>, vector<2x32xf32>
      tpu.vector_store %arg23[%c0_26, %c0_27], %46 {strides = array<i32>} : memref<2x32xf32, #tpu.memory_space<vmem>>, vector<2x32xf32>,
    } else {
    }
    %c0 = arith.constant 0 : index
    %c0_1 = arith.constant 0 : index
    %c0_2 = arith.constant 0 : index
    %3 = vector.load %arg1[%c0, %c0_1, %c0_2] : memref<1x2x16xbf16, #tpu.memory_space<vmem>>, vector<1x2x16xbf16>
    %4 = vector.shape_cast %3 : vector<1x2x16xbf16> to vector<2x16xbf16>
    %c0_3 = arith.constant 0 : index
    %c0_4 = arith.constant 0 : index
    %5 = vector.load %arg3[%c0_3, %c0_4] : memref<16x32xbf16, #tpu.memory_space<vmem>>, vector<16x32xbf16>
    %cst = arith.constant dense<0.000000e+00> : vector<2x32xf32>
    %6 = tpu.matmul %4, %5, %cst {dimension_numbers = #tpu.dot_dimension_numbers<[1], [0], [0], [1], [0, 0, 1, 1], [], []>} : vector<2x16xbf16>, vector<16x32xbf16>, vector<2x32xf32> -> vector<2x32xf32>
    %c0_5 = arith.constant 0 : index
    %c0_6 = arith.constant 0 : index
    %7 = vector.load %arg4[%c0_5, %c0_6] : memref<1x32xf32, #tpu.memory_space<vmem>>, vector<1x32xf32>
    %8 = vector.broadcast %7 : vector<1x32xf32> to vector<2x32xf32>
    %9 = arith.addf %6, %8 : vector<2x32xf32>
    %c0_7 = arith.constant 0 : index
    %c0_8 = arith.constant 0 : index
    %c0_9 = arith.constant 0 : index
    %10 = vector.load %arg2[%c0_7, %c0_8, %c0_9] : memref<1x1x32xf32, #tpu.memory_space<vmem>>, vector<1x1x32xf32>
    %11 = vector.shape_cast %10 : vector<1x1x32xf32> to vector<1x32xf32>
    %12 = vector.broadcast %11 : vector<1x32xf32> to vector<2x32xf32>
    %13 = arith.addf %9, %12 : vector<2x32xf32>
    %c0_i32_10 = arith.constant 0 : i32
    %c2_i32 = arith.constant 2 : i32
    %14 = arith.addi %c0_i32_10, %c2_i32 : i32
    %c1_i32 = arith.constant 1 : i32
    %15 = scf.for %arg24 = %c0_i32_10 to %14 step %c1_i32 iter_args(%arg25 = %13) -> (vector<2x32xf32>)  : i32 {
      %c0_25 = arith.constant 0 : index
      %c0_26 = arith.constant 0 : index
      %46 = vector.load %arg5[%c0_25, %c0_26] : memref<1x32xf32, #tpu.memory_space<vmem>>, vector<1x32xf32>
      %c0_27 = arith.constant 0 : index
      %c0_28 = arith.constant 0 : index
      %47 = vector.load %arg6[%c0_27, %c0_28] : memref<1x32xf32, #tpu.memory_space<vmem>>, vector<1x32xf32>
      %cst_29 = arith.constant dense<0.000000e+00> : vector<2xf32>
      %48 = vector.multi_reduction <add>, %arg25, %cst_29 [1] : vector<2x32xf32> to vector<2xf32>
      %49 = vector.shape_cast %48 : vector<2xf32> to vector<2x1xf32>
      %cst_30 = arith.constant 3.200000e+01 : f32
      %50 = vector.broadcast %cst_30 : f32 to vector<2x1xf32>
      %51 = arith.divf %49, %50 : vector<2x1xf32>
      %52 = vector.broadcast %51 : vector<2x1xf32> to vector<2x32xf32>
      %53 = arith.subf %arg25, %52 : vector<2x32xf32>
      %54 = arith.mulf %53, %53 : vector<2x32xf32>
      %cst_31 = arith.constant dense<0.000000e+00> : vector<2xf32>
      %55 = vector.multi_reduction <add>, %54, %cst_31 [1] : vector<2x32xf32> to vector<2xf32>
      %56 = vector.shape_cast %55 : vector<2xf32> to vector<2x1xf32>
      %cst_32 = arith.constant 3.200000e+01 : f32
      %57 = vector.broadcast %cst_32 : f32 to vector<2x1xf32>
      %58 = arith.divf %56, %57 : vector<2x1xf32>
      %59 = vector.broadcast %51 : vector<2x1xf32> to vector<2x32xf32>
      %60 = arith.subf %arg25, %59 : vector<2x32xf32>
      %cst_33 = arith.constant 9.99999974E-6 : f32
      %61 = vector.broadcast %cst_33 : f32 to vector<2x1xf32>
      %62 = arith.addf %58, %61 : vector<2x1xf32>
      %63 = math.rsqrt %62 : vector<2x1xf32>
      %64 = vector.broadcast %63 : vector<2x1xf32> to vector<2x32xf32>
      %65 = arith.mulf %60, %64 : vector<2x32xf32>
      %66 = vector.broadcast %46 : vector<1x32xf32> to vector<2x32xf32>
      %67 = arith.mulf %65, %66 : vector<2x32xf32>
      %68 = vector.broadcast %47 : vector<1x32xf32> to vector<2x32xf32>
      %69 = arith.addf %67, %68 : vector<2x32xf32>
      %70 = arith.truncf %69 : vector<2x32xf32> to vector<2x32xbf16>
      %c0_34 = arith.constant 0 : index
      %c0_35 = arith.constant 0 : index
      %71 = vector.load %arg7[%c0_34, %c0_35] : memref<32x96xbf16, #tpu.memory_space<vmem>>, vector<32x96xbf16>
      %cst_36 = arith.constant dense<0.000000e+00> : vector<2x96xf32>
      %72 = tpu.matmul %70, %71, %cst_36 {dimension_numbers = #tpu.dot_dimension_numbers<[1], [0], [0], [1], [0, 0, 1, 1], [], []>} : vector<2x32xbf16>, vector<32x96xbf16>, vector<2x96xf32> -> vector<2x96xf32>
      %c0_37 = arith.constant 0 : index
      %c0_38 = arith.constant 0 : index
      %73 = vector.load %arg8[%c0_37, %c0_38] : memref<1x96xf32, #tpu.memory_space<vmem>>, vector<1x96xf32>
      %74 = vector.broadcast %73 : vector<1x96xf32> to vector<2x96xf32>
      %75 = arith.addf %72, %74 : vector<2x96xf32>
      %76 = vector.extract_strided_slice %75 {offsets = [0, 0], sizes = [2, 8], strides = [1, 1]} : vector<2x96xf32> to vector<2x8xf32>
      %77 = vector.extract_strided_slice %75 {offsets = [0, 32], sizes = [2, 8], strides = [1, 1]} : vector<2x96xf32> to vector<2x8xf32>
      %78 = vector.extract_strided_slice %75 {offsets = [0, 64], sizes = [2, 8], strides = [1, 1]} : vector<2x96xf32> to vector<2x8xf32>
      %cst_39 = arith.constant dense<0.000000e+00> : vector<2x2xf32>
      %79 = tpu.matmul %76, %77, %cst_39 {dimension_numbers = #tpu.dot_dimension_numbers<[1], [1], [0], [0], [0, 0, 1, 0], [], []>} : vector<2x8xf32>, vector<2x8xf32>, vector<2x2xf32> -> vector<2x2xf32>
      %cst_40 = arith.constant dense<0xFF800000> : vector<2xf32>
      %80 = vector.multi_reduction <maximumf>, %79, %cst_40 [1] : vector<2x2xf32> to vector<2xf32>
      %81 = vector.shape_cast %80 : vector<2xf32> to vector<2x1xf32>
      %82 = vector.broadcast %81 : vector<2x1xf32> to vector<2x2xf32>
      %83 = arith.subf %79, %82 : vector<2x2xf32>
      %84 = math.exp %83 : vector<2x2xf32>
      %cst_41 = arith.constant dense<0.000000e+00> : vector<2xf32>
      %85 = vector.multi_reduction <add>, %84, %cst_41 [1] : vector<2x2xf32> to vector<2xf32>
      %86 = vector.shape_cast %85 : vector<2xf32> to vector<2x1xf32>
      %87 = tpu.reciprocal %86 {approx = true} : vector<2x1xf32> -> vector<2x1xf32>
      %88 = vector.broadcast %87 : vector<2x1xf32> to vector<2x2xf32>
      %89 = arith.mulf %84, %88 : vector<2x2xf32>
      %90 = arith.truncf %89 : vector<2x2xf32> to vector<2x2xbf16>
      %91 = arith.truncf %78 : vector<2x8xf32> to vector<2x8xbf16>
      %cst_42 = arith.constant dense<0.000000e+00> : vector<2x8xf32>
      %92 = tpu.matmul %90, %91, %cst_42 {dimension_numbers = #tpu.dot_dimension_numbers<[1], [0], [0], [1], [0, 0, 1, 1], [], []>} : vector<2x2xbf16>, vector<2x8xbf16>, vector<2x8xf32> -> vector<2x8xf32>
      %c0_43 = arith.constant 0 : index
      %c0_44 = arith.constant 0 : index
      %93 = vector.load %arg22[%c0_43, %c0_44] : memref<2x32xf32, #tpu.memory_space<vmem>>, vector<2x8xf32>
      tpu.vector_store %arg22[%c0_43, %c0_44], %92 {strides = array<i32>} : memref<2x32xf32, #tpu.memory_space<vmem>>, vector<2x8xf32>,
      %94 = vector.extract_strided_slice %75 {offsets = [0, 8], sizes = [2, 8], strides = [1, 1]} : vector<2x96xf32> to vector<2x8xf32>
      %95 = vector.extract_strided_slice %75 {offsets = [0, 40], sizes = [2, 8], strides = [1, 1]} : vector<2x96xf32> to vector<2x8xf32>
      %96 = vector.extract_strided_slice %75 {offsets = [0, 72], sizes = [2, 8], strides = [1, 1]} : vector<2x96xf32> to vector<2x8xf32>
      %cst_45 = arith.constant dense<0.000000e+00> : vector<2x2xf32>
      %97 = tpu.matmul %94, %95, %cst_45 {dimension_numbers = #tpu.dot_dimension_numbers<[1], [1], [0], [0], [0, 0, 1, 0], [], []>} : vector<2x8xf32>, vector<2x8xf32>, vector<2x2xf32> -> vector<2x2xf32>
      %cst_46 = arith.constant dense<0xFF800000> : vector<2xf32>
      %98 = vector.multi_reduction <maximumf>, %97, %cst_46 [1] : vector<2x2xf32> to vector<2xf32>
      %99 = vector.shape_cast %98 : vector<2xf32> to vector<2x1xf32>
      %100 = vector.broadcast %99 : vector<2x1xf32> to vector<2x2xf32>
      %101 = arith.subf %97, %100 : vector<2x2xf32>
      %102 = math.exp %101 : vector<2x2xf32>
      %cst_47 = arith.constant dense<0.000000e+00> : vector<2xf32>
      %103 = vector.multi_reduction <add>, %102, %cst_47 [1] : vector<2x2xf32> to vector<2xf32>
      %104 = vector.shape_cast %103 : vector<2xf32> to vector<2x1xf32>
      %105 = tpu.reciprocal %104 {approx = true} : vector<2x1xf32> -> vector<2x1xf32>
      %106 = vector.broadcast %105 : vector<2x1xf32> to vector<2x2xf32>
      %107 = arith.mulf %102, %106 : vector<2x2xf32>
      %108 = arith.truncf %107 : vector<2x2xf32> to vector<2x2xbf16>
      %109 = arith.truncf %96 : vector<2x8xf32> to vector<2x8xbf16>
      %cst_48 = arith.constant dense<0.000000e+00> : vector<2x8xf32>
      %110 = tpu.matmul %108, %109, %cst_48 {dimension_numbers = #tpu.dot_dimension_numbers<[1], [0], [0], [1], [0, 0, 1, 1], [], []>} : vector<2x2xbf16>, vector<2x8xbf16>, vector<2x8xf32> -> vector<2x8xf32>
      %c0_49 = arith.constant 0 : index
      %c8 = arith.constant 8 : index
      %111 = vector.load %arg22[%c0_49, %c8] : memref<2x32xf32, #tpu.memory_space<vmem>>, vector<2x8xf32>
      tpu.vector_store %arg22[%c0_49, %c8], %110 {strides = array<i32>} : memref<2x32xf32, #tpu.memory_space<vmem>>, vector<2x8xf32>,
      %112 = vector.extract_strided_slice %75 {offsets = [0, 16], sizes = [2, 8], strides = [1, 1]} : vector<2x96xf32> to vector<2x8xf32>
      %113 = vector.extract_strided_slice %75 {offsets = [0, 48], sizes = [2, 8], strides = [1, 1]} : vector<2x96xf32> to vector<2x8xf32>
      %114 = vector.extract_strided_slice %75 {offsets = [0, 80], sizes = [2, 8], strides = [1, 1]} : vector<2x96xf32> to vector<2x8xf32>
      %cst_50 = arith.constant dense<0.000000e+00> : vector<2x2xf32>
      %115 = tpu.matmul %112, %113, %cst_50 {dimension_numbers = #tpu.dot_dimension_numbers<[1], [1], [0], [0], [0, 0, 1, 0], [], []>} : vector<2x8xf32>, vector<2x8xf32>, vector<2x2xf32> -> vector<2x2xf32>
      %cst_51 = arith.constant dense<0xFF800000> : vector<2xf32>
      %116 = vector.multi_reduction <maximumf>, %115, %cst_51 [1] : vector<2x2xf32> to vector<2xf32>
      %117 = vector.shape_cast %116 : vector<2xf32> to vector<2x1xf32>
      %118 = vector.broadcast %117 : vector<2x1xf32> to vector<2x2xf32>
      %119 = arith.subf %115, %118 : vector<2x2xf32>
      %120 = math.exp %119 : vector<2x2xf32>
      %cst_52 = arith.constant dense<0.000000e+00> : vector<2xf32>
      %121 = vector.multi_reduction <add>, %120, %cst_52 [1] : vector<2x2xf32> to vector<2xf32>
      %122 = vector.shape_cast %121 : vector<2xf32> to vector<2x1xf32>
      %123 = tpu.reciprocal %122 {approx = true} : vector<2x1xf32> -> vector<2x1xf32>
      %124 = vector.broadcast %123 : vector<2x1xf32> to vector<2x2xf32>
      %125 = arith.mulf %120, %124 : vector<2x2xf32>
      %126 = arith.truncf %125 : vector<2x2xf32> to vector<2x2xbf16>
      %127 = arith.truncf %114 : vector<2x8xf32> to vector<2x8xbf16>
      %cst_53 = arith.constant dense<0.000000e+00> : vector<2x8xf32>
      %128 = tpu.matmul %126, %127, %cst_53 {dimension_numbers = #tpu.dot_dimension_numbers<[1], [0], [0], [1], [0, 0, 1, 1], [], []>} : vector<2x2xbf16>, vector<2x8xbf16>, vector<2x8xf32> -> vector<2x8xf32>
      %c0_54 = arith.constant 0 : index
      %c16 = arith.constant 16 : index
      %129 = vector.load %arg22[%c0_54, %c16] : memref<2x32xf32, #tpu.memory_space<vmem>>, vector<2x8xf32>
      tpu.vector_store %arg22[%c0_54, %c16], %128 {strides = array<i32>} : memref<2x32xf32, #tpu.memory_space<vmem>>, vector<2x8xf32>,
      %130 = vector.extract_strided_slice %75 {offsets = [0, 24], sizes = [2, 8], strides = [1, 1]} : vector<2x96xf32> to vector<2x8xf32>
      %131 = vector.extract_strided_slice %75 {offsets = [0, 56], sizes = [2, 8], strides = [1, 1]} : vector<2x96xf32> to vector<2x8xf32>
      %132 = vector.extract_strided_slice %75 {offsets = [0, 88], sizes = [2, 8], strides = [1, 1]} : vector<2x96xf32> to vector<2x8xf32>
      %cst_55 = arith.constant dense<0.000000e+00> : vector<2x2xf32>
      %133 = tpu.matmul %130, %131, %cst_55 {dimension_numbers = #tpu.dot_dimension_numbers<[1], [1], [0], [0], [0, 0, 1, 0], [], []>} : vector<2x8xf32>, vector<2x8xf32>, vector<2x2xf32> -> vector<2x2xf32>
      %cst_56 = arith.constant dense<0xFF800000> : vector<2xf32>
      %134 = vector.multi_reduction <maximumf>, %133, %cst_56 [1] : vector<2x2xf32> to vector<2xf32>
      %135 = vector.shape_cast %134 : vector<2xf32> to vector<2x1xf32>
      %136 = vector.broadcast %135 : vector<2x1xf32> to vector<2x2xf32>
      %137 = arith.subf %133, %136 : vector<2x2xf32>
      %138 = math.exp %137 : vector<2x2xf32>
      %cst_57 = arith.constant dense<0.000000e+00> : vector<2xf32>
      %139 = vector.multi_reduction <add>, %138, %cst_57 [1] : vector<2x2xf32> to vector<2xf32>
      %140 = vector.shape_cast %139 : vector<2xf32> to vector<2x1xf32>
      %141 = tpu.reciprocal %140 {approx = true} : vector<2x1xf32> -> vector<2x1xf32>
      %142 = vector.broadcast %141 : vector<2x1xf32> to vector<2x2xf32>
      %143 = arith.mulf %138, %142 : vector<2x2xf32>
      %144 = arith.truncf %143 : vector<2x2xf32> to vector<2x2xbf16>
      %145 = arith.truncf %132 : vector<2x8xf32> to vector<2x8xbf16>
      %cst_58 = arith.constant dense<0.000000e+00> : vector<2x8xf32>
      %146 = tpu.matmul %144, %145, %cst_58 {dimension_numbers = #tpu.dot_dimension_numbers<[1], [0], [0], [1], [0, 0, 1, 1], [], []>} : vector<2x2xbf16>, vector<2x8xbf16>, vector<2x8xf32> -> vector<2x8xf32>
      %c0_59 = arith.constant 0 : index
      %c24 = arith.constant 24 : index
      %147 = vector.load %arg22[%c0_59, %c24] : memref<2x32xf32, #tpu.memory_space<vmem>>, vector<2x8xf32>
      tpu.vector_store %arg22[%c0_59, %c24], %146 {strides = array<i32>} : memref<2x32xf32, #tpu.memory_space<vmem>>, vector<2x8xf32>,
      %c0_60 = arith.constant 0 : index
      %c0_61 = arith.constant 0 : index
      %148 = vector.load %arg22[%c0_60, %c0_61] : memref<2x32xf32, #tpu.memory_space<vmem>>, vector<2x32xf32>
      %149 = arith.truncf %148 : vector<2x32xf32> to vector<2x32xbf16>
      %c0_62 = arith.constant 0 : index
      %c0_63 = arith.constant 0 : index
      %150 = vector.load %arg9[%c0_62, %c0_63] : memref<32x32xbf16, #tpu.memory_space<vmem>>, vector<32x32xbf16>
      %cst_64 = arith.constant dense<0.000000e+00> : vector<2x32xf32>
      %151 = tpu.matmul %149, %150, %cst_64 {dimension_numbers = #tpu.dot_dimension_numbers<[1], [0], [0], [1], [0, 0, 1, 1], [], []>} : vector<2x32xbf16>, vector<32x32xbf16>, vector<2x32xf32> -> vector<2x32xf32>
      %c0_65 = arith.constant 0 : index
      %c0_66 = arith.constant 0 : index
      %152 = vector.load %arg10[%c0_65, %c0_66] : memref<1x32xf32, #tpu.memory_space<vmem>>, vector<1x32xf32>
      %153 = vector.broadcast %152 : vector<1x32xf32> to vector<2x32xf32>
      %154 = arith.addf %151, %153 : vector<2x32xf32>
      %155 = arith.addf %arg25, %154 : vector<2x32xf32>
      %c0_67 = arith.constant 0 : index
      %c0_68 = arith.constant 0 : index
      %156 = vector.load %arg11[%c0_67, %c0_68] : memref<1x32xf32, #tpu.memory_space<vmem>>, vector<1x32xf32>
      %c0_69 = arith.constant 0 : index
      %c0_70 = arith.constant 0 : index
      %157 = vector.load %arg12[%c0_69, %c0_70] : memref<1x32xf32, #tpu.memory_space<vmem>>, vector<1x32xf32>
      %cst_71 = arith.constant dense<0.000000e+00> : vector<2xf32>
      %158 = vector.multi_reduction <add>, %155, %cst_71 [1] : vector<2x32xf32> to vector<2xf32>
      %159 = vector.shape_cast %158 : vector<2xf32> to vector<2x1xf32>
      %cst_72 = arith.constant 3.200000e+01 : f32
      %160 = vector.broadcast %cst_72 : f32 to vector<2x1xf32>
      %161 = arith.divf %159, %160 : vector<2x1xf32>
      %162 = vector.broadcast %161 : vector<2x1xf32> to vector<2x32xf32>
      %163 = arith.subf %155, %162 : vector<2x32xf32>
      %164 = arith.mulf %163, %163 : vector<2x32xf32>
      %cst_73 = arith.constant dense<0.000000e+00> : vector<2xf32>
      %165 = vector.multi_reduction <add>, %164, %cst_73 [1] : vector<2x32xf32> to vector<2xf32>
      %166 = vector.shape_cast %165 : vector<2xf32> to vector<2x1xf32>
      %cst_74 = arith.constant 3.200000e+01 : f32
      %167 = vector.broadcast %cst_74 : f32 to vector<2x1xf32>
      %168 = arith.divf %166, %167 : vector<2x1xf32>
      %169 = vector.broadcast %161 : vector<2x1xf32> to vector<2x32xf32>
      %170 = arith.subf %155, %169 : vector<2x32xf32>
      %cst_75 = arith.constant 9.99999974E-6 : f32
      %171 = vector.broadcast %cst_75 : f32 to vector<2x1xf32>
      %172 = arith.addf %168, %171 : vector<2x1xf32>
      %173 = math.rsqrt %172 : vector<2x1xf32>
      %174 = vector.broadcast %173 : vector<2x1xf32> to vector<2x32xf32>
      %175 = arith.mulf %170, %174 : vector<2x32xf32>
      %176 = vector.broadcast %156 : vector<1x32xf32> to vector<2x32xf32>
      %177 = arith.mulf %175, %176 : vector<2x32xf32>
      %178 = vector.broadcast %157 : vector<1x32xf32> to vector<2x32xf32>
      %179 = arith.addf %177, %178 : vector<2x32xf32>
      %180 = arith.truncf %179 : vector<2x32xf32> to vector<2x32xbf16>
      %c0_76 = arith.constant 0 : index
      %c0_77 = arith.constant 0 : index
      %181 = vector.load %arg13[%c0_76, %c0_77] : memref<32x64xbf16, #tpu.memory_space<vmem>>, vector<32x64xbf16>
      %cst_78 = arith.constant dense<0.000000e+00> : vector<2x64xf32>
      %182 = tpu.matmul %180, %181, %cst_78 {dimension_numbers = #tpu.dot_dimension_numbers<[1], [0], [0], [1], [0, 0, 1, 1], [], []>} : vector<2x32xbf16>, vector<32x64xbf16>, vector<2x64xf32> -> vector<2x64xf32>
      %c0_79 = arith.constant 0 : index
      %c0_80 = arith.constant 0 : index
      %183 = vector.load %arg14[%c0_79, %c0_80] : memref<1x64xf32, #tpu.memory_space<vmem>>, vector<1x64xf32>
      %184 = vector.broadcast %183 : vector<1x64xf32> to vector<2x64xf32>
      %185 = arith.addf %182, %184 : vector<2x64xf32>
      %186 = arith.truncf %185 : vector<2x64xf32> to vector<2x64xbf16>
      %c0_81 = arith.constant 0 : index
      %c0_82 = arith.constant 0 : index
      %187 = vector.load %arg15[%c0_81, %c0_82] : memref<64x32xbf16, #tpu.memory_space<vmem>>, vector<64x32xbf16>
      %cst_83 = arith.constant dense<0.000000e+00> : vector<2x32xf32>
      %188 = tpu.matmul %186, %187, %cst_83 {dimension_numbers = #tpu.dot_dimension_numbers<[1], [0], [0], [1], [0, 0, 1, 1], [], []>} : vector<2x64xbf16>, vector<64x32xbf16>, vector<2x32xf32> -> vector<2x32xf32>
      %c0_84 = arith.constant 0 : index
      %c0_85 = arith.constant 0 : index
      %189 = vector.load %arg16[%c0_84, %c0_85] : memref<1x32xf32, #tpu.memory_space<vmem>>, vector<1x32xf32>
      %190 = vector.broadcast %189 : vector<1x32xf32> to vector<2x32xf32>
      %191 = arith.addf %188, %190 : vector<2x32xf32>
      %192 = arith.addf %155, %191 : vector<2x32xf32>
      scf.yield %192 : vector<2x32xf32>
    }
    %c0_11 = arith.constant 0 : index
    %c0_12 = arith.constant 0 : index
    %16 = vector.load %arg23[%c0_11, %c0_12] : memref<2x32xf32, #tpu.memory_space<vmem>>, vector<2x32xf32>
    %c0_13 = arith.constant 0 : index
    %c0_14 = arith.constant 0 : index
    %17 = vector.load %arg17[%c0_13, %c0_14] : memref<1x32xf32, #tpu.memory_space<vmem>>, vector<1x32xf32>
    %c0_15 = arith.constant 0 : index
    %c0_16 = arith.constant 0 : index
    %18 = vector.load %arg18[%c0_15, %c0_16] : memref<1x32xf32, #tpu.memory_space<vmem>>, vector<1x32xf32>
    %cst_17 = arith.constant dense<0.000000e+00> : vector<2xf32>
    %19 = vector.multi_reduction <add>, %15, %cst_17 [1] : vector<2x32xf32> to vector<2xf32>
    %20 = vector.shape_cast %19 : vector<2xf32> to vector<2x1xf32>
    %cst_18 = arith.constant 3.200000e+01 : f32
    %21 = vector.broadcast %cst_18 : f32 to vector<2x1xf32>
    %22 = arith.divf %20, %21 : vector<2x1xf32>
    %23 = vector.broadcast %22 : vector<2x1xf32> to vector<2x32xf32>
    %24 = arith.subf %15, %23 : vector<2x32xf32>
    %25 = arith.mulf %24, %24 : vector<2x32xf32>
    %cst_19 = arith.constant dense<0.000000e+00> : vector<2xf32>
    %26 = vector.multi_reduction <add>, %25, %cst_19 [1] : vector<2x32xf32> to vector<2xf32>
    %27 = vector.shape_cast %26 : vector<2xf32> to vector<2x1xf32>
    %cst_20 = arith.constant 3.200000e+01 : f32
    %28 = vector.broadcast %cst_20 : f32 to vector<2x1xf32>
    %29 = arith.divf %27, %28 : vector<2x1xf32>
    %30 = vector.broadcast %22 : vector<2x1xf32> to vector<2x32xf32>
    %31 = arith.subf %15, %30 : vector<2x32xf32>
    %cst_21 = arith.constant 9.99999974E-6 : f32
    %32 = vector.broadcast %cst_21 : f32 to vector<2x1xf32>
    %33 = arith.addf %29, %32 : vector<2x1xf32>
    %34 = math.rsqrt %33 : vector<2x1xf32>
    %35 = vector.broadcast %34 : vector<2x1xf32> to vector<2x32xf32>
    %36 = arith.mulf %31, %35 : vector<2x32xf32>
    %37 = vector.broadcast %17 : vector<1x32xf32> to vector<2x32xf32>
    %38 = arith.mulf %36, %37 : vector<2x32xf32>
    %39 = vector.broadcast %18 : vector<1x32xf32> to vector<2x32xf32>
    %40 = arith.addf %38, %39 : vector<2x32xf32>
    %41 = arith.addf %16, %40 : vector<2x32xf32>
    %c0_22 = arith.constant 0 : index
    %c0_23 = arith.constant 0 : index
    %42 = vector.load %arg23[%c0_22, %c0_23] : memref<2x32xf32, #tpu.memory_space<vmem>>, vector<2x32xf32>
    tpu.vector_store %arg23[%c0_22, %c0_23], %41 {strides = array<i32>} : memref<2x32xf32, #tpu.memory_space<vmem>>, vector<2x32xf32>,
    %c7_i32 = arith.constant 7 : i32
    %43 = arith.cmpi eq, %arg0, %c7_i32 : i32
    %44 = arith.extui %43 : i1 to i32
    %c0_i32_24 = arith.constant 0 : i32
    %45 = arith.cmpi ne, %44, %c0_i32_24 : i32
    scf.if %45 {
      %c0_25 = arith.constant 0 : index
      %c0_26 = arith.constant 0 : index
      %46 = vector.load %arg23[%c0_25, %c0_26] : memref<2x32xf32, #tpu.memory_space<vmem>>, vector<2x32xf32>
      %cst_27 = arith.constant 1.250000e-01 : f32
      %47 = vector.broadcast %cst_27 : f32 to vector<2x32xf32>
      %48 = arith.mulf %46, %47 : vector<2x32xf32>
      %49 = arith.truncf %48 : vector<2x32xf32> to vector<2x32xbf16>
      %c0_28 = arith.constant 0 : index
      %c0_29 = arith.constant 0 : index
      %50 = vector.load %arg19[%c0_28, %c0_29] : memref<32x128xbf16, #tpu.memory_space<vmem>>, vector<32x128xbf16>
      %cst_30 = arith.constant dense<0.000000e+00> : vector<2x128xf32>
      %51 = tpu.matmul %49, %50, %cst_30 {dimension_numbers = #tpu.dot_dimension_numbers<[1], [0], [0], [1], [0, 0, 1, 1], [], []>} : vector<2x32xbf16>, vector<32x128xbf16>, vector<2x128xf32> -> vector<2x128xf32>
      %c0_31 = arith.constant 0 : index
      %c0_32 = arith.constant 0 : index
      %52 = vector.load %arg20[%c0_31, %c0_32] : memref<1x128xf32, #tpu.memory_space<vmem>>, vector<1x128xf32>
      %53 = vector.broadcast %52 : vector<1x128xf32> to vector<2x128xf32>
      %54 = arith.addf %51, %53 : vector<2x128xf32>
      %c0_33 = arith.constant 0 : index
      %c0_34 = arith.constant 0 : index
      %55 = vector.load %arg21[%c0_33, %c0_34] : memref<2x128xf32, #tpu.memory_space<vmem>>, vector<2x128xf32>
      tpu.vector_store %arg21[%c0_33, %c0_34], %54 {strides = array<i32>} : memref<2x128xf32, #tpu.memory_space<vmem>>, vector<2x128xf32>,
    } else {
    }
    return
  }
  func.func @transform_0(%arg0: i32) -> (i32, i32, i32) {
    %c0_i32 = arith.constant 0 : i32
    %c0_i32_0 = arith.constant 0 : i32
    %c0_i32_1 = arith.constant 0 : i32
    return %arg0, %c0_i32, %c0_i32_0 : i32, i32, i32
  }
  func.func @transform_1(%arg0: i32) -> (i32, i32, i32) {
    %c0_i32 = arith.constant 0 : i32
    %c0_i32_0 = arith.constant 0 : i32
    %c0_i32_1 = arith.constant 0 : i32
    return %arg0, %c0_i32, %c0_i32_0 : i32, i32, i32
  }
  func.func @transform_2(%arg0: i32) -> (i32, i32) {
    %c0_i32 = arith.constant 0 : i32
    %c0_i32_0 = arith.constant 0 : i32
    %c0_i32_1 = arith.constant 0 : i32
    return %c0_i32, %c0_i32_0 : i32, i32
  }
  func.func @transform_3(%arg0: i32) -> (i32, i32) {
    %c0_i32 = arith.constant 0 : i32
    %c0_i32_0 = arith.constant 0 : i32
    %c0_i32_1 = arith.constant 0 : i32
    return %c0_i32, %c0_i32_0 : i32, i32
  }
  func.func @transform_4(%arg0: i32) -> (i32, i32) {
    %c0_i32 = arith.constant 0 : i32
    %c0_i32_0 = arith.constant 0 : i32
    %c0_i32_1 = arith.constant 0 : i32
    return %c0_i32, %c0_i32_0 : i32, i32
  }
  func.func @transform_5(%arg0: i32) -> (i32, i32) {
    %c0_i32 = arith.constant 0 : i32
    %c0_i32_0 = arith.constant 0 : i32
    %c0_i32_1 = arith.constant 0 : i32
    return %c0_i32, %c0_i32_0 : i32, i32
  }
  func.func @transform_6(%arg0: i32) -> (i32, i32) {
    %c0_i32 = arith.constant 0 : i32
    %c0_i32_0 = arith.constant 0 : i32
    %c0_i32_1 = arith.constant 0 : i32
    return %c0_i32, %c0_i32_0 : i32, i32
  }
  func.func @transform_7(%arg0: i32) -> (i32, i32) {
    %c0_i32 = arith.constant 0 : i32
    %c0_i32_0 = arith.constant 0 : i32
    %c0_i32_1 = arith.constant 0 : i32
    return %c0_i32, %c0_i32_0 : i32, i32
  }
  func.func @transform_8(%arg0: i32) -> (i32, i32) {
    %c0_i32 = arith.constant 0 : i32
    %c0_i32_0 = arith.constant 0 : i32
    %c0_i32_1 = arith.constant 0 : i32
    return %c0_i32, %c0_i32_0 : i32, i32
  }
  func.func @transform_9(%arg0: i32) -> (i32, i32) {
    %c0_i32 = arith.constant 0 : i32
    %c0_i32_0 = arith.constant 0 : i32
    %c0_i32_1 = arith.constant 0 : i32
    return %c0_i32, %c0_i32_0 : i32, i32
  }
  func.func @transform_10(%arg0: i32) -> (i32, i32) {
    %c0_i32 = arith.constant 0 : i32
    %c0_i32_0 = arith.constant 0 : i32
    %c0_i32_1 = arith.constant 0 : i32
    return %c0_i32, %c0_i32_0 : i32, i32
  }
  func.func @transform_11(%arg0: i32) -> (i32, i32) {
    %c0_i32 = arith.constant 0 : i32
    %c0_i32_0 = arith.constant 0 : i32
    %c0_i32_1 = arith.constant 0 : i32
    return %c0_i32, %c0_i32_0 : i32, i32
  }
  func.func @transform_12(%arg0: i32) -> (i32, i32) {
    %c0_i32 = arith.constant 0 : i32
    %c0_i32_0 = arith.constant 0 : i32
    %c0_i32_1 = arith.constant 0 : i32
    return %c0_i32, %c0_i32_0 : i32, i32
  }
  func.func @transform_13(%arg0: i32) -> (i32, i32) {
    %c0_i32 = arith.constant 0 : i32
    %c0_i32_0 = arith.constant 0 : i32
    %c0_i32_1 = arith.constant 0 : i32
    return %c0_i32, %c0_i32_0 : i32, i32
  }
  func.func @transform_14(%arg0: i32) -> (i32, i32) {
    %c0_i32 = arith.constant 0 : i32
    %c0_i32_0 = arith.constant 0 : i32
    %c0_i32_1 = arith.constant 0 : i32
    return %c0_i32, %c0_i32_0 : i32, i32
  }
  func.func @transform_15(%arg0: i32) -> (i32, i32) {
    %c0_i32 = arith.constant 0 : i32
    %c0_i32_0 = arith.constant 0 : i32
    %c0_i32_1 = arith.constant 0 : i32
    return %c0_i32, %c0_i32_0 : i32, i32
  }
  func.func @transform_16(%arg0: i32) -> (i32, i32) {
    %c0_i32 = arith.constant 0 : i32
    %c0_i32_0 = arith.constant 0 : i32
    %c0_i32_1 = arith.constant 0 : i32
    return %c0_i32, %c0_i32_0 : i32, i32
  }
  func.func @transform_17(%arg0: i32) -> (i32, i32) {
    %c0_i32 = arith.constant 0 : i32
    %c0_i32_0 = arith.constant 0 : i32
    %c0_i32_1 = arith.constant 0 : i32
    return %c0_i32, %c0_i32_0 : i32, i32
  }
  func.func @transform_18(%arg0: i32) -> (i32, i32) {
    %c0_i32 = arith.constant 0 : i32
    %c0_i32_0 = arith.constant 0 : i32
    %c0_i32_1 = arith.constant 0 : i32
    return %c0_i32, %c0_i32_0 : i32, i32
  }
  func.func @transform_19(%arg0: i32) -> (i32, i32) {
    %c0_i32 = arith.constant 0 : i32
    %c0_i32_0 = arith.constant 0 : i32
    %c0_i32_1 = arith.constant 0 : i32
    return %c0_i32, %c0_i32_0 : i32, i32
  }
  func.func @transform_20(%arg0: i32) -> (i32, i32) {
    %c0_i32 = arith.constant 0 : i32
    %c0_i32_0 = arith.constant 0 : i32
    %c0_i32_1 = arith.constant 0 : i32
    return %c0_i32, %c0_i32_0 : i32, i32
  }
}

</mosaic_0001>

<bundles_post_ra>
// kernel: tpu_custom_call.1
= control target key start
LH: loop header
LB: loop body
LE: loop exit
PB: predicated region body
PF: predicated region fallthrough
CT: control target
= control target key end

     0   :  { %s3032_s0 = inlined_call_operand.hbm [shape: bf16[8,2,16], index: 0, kind: input, shape index: {}]   ;;  %s3033_s1 = inlined_call_operand.hbm [shape: f32[8,1,32], index: 1, kind: input, shape index: {}]   ;;  %s3034_s2 = inlined_call_operand.hbm [shape: bf16[16,32], index: 2, kind: input, shape index: {}]   ;;  %s3035_s3 = inlined_call_operand.hbm [shape: f32[1,32], index: 3, kind: input, shape index: {}]   ;;  %s3036_s4 = inlined_call_operand.hbm [shape: f32[1,32], index: 4, kind: input, shape index: {}]   ;;  %s3037_s5 = inlined_call_operand.hbm [shape: f32[1,32], index: 5, kind: input, shape index: {}]   ;;  %s3038_s6 = inlined_call_operand.vmem [shape: bf16[32,96], index: 6, kind: input, shape index: {}]   ;;  %s3039_s7 = inlined_call_operand.hbm [shape: f32[1,96], index: 7, kind: input, shape index: {}]   ;;  %s3040_s8 = inlined_call_operand.vmem [shape: bf16[32,32], index: 8, kind: input, shape index: {}]   ;;  %s3041_s9 = inlined_call_operand.hbm [shape: f32[1,32], index: 9, kind: input, shape index: {}]   ;;  %s3042_s10 = inlined_call_operand.hbm [shape: f32[1,32], index: 10, kind: input, shape index: {}]   ;;  %s3043_s11 = inlined_call_operand.hbm [shape: f32[1,32], index: 11, kind: input, shape index: {}]   ;;  %s3044_s12 = inlined_call_operand.vmem [shape: bf16[32,64], index: 12, kind: input, shape index: {}]   ;;  %s3045_s13 = inlined_call_operand.hbm [shape: f32[1,64], index: 13, kind: input, shape index: {}]   ;;  %s3046_s14 = inlined_call_operand.vmem [shape: bf16[64,32], index: 14, kind: input, shape index: {}]   ;;  %s3047_s15 = inlined_call_operand.hbm [shape: f32[1,32], index: 15, kind: input, shape index: {}]   ;;  %s3048_s16 = inlined_call_operand.hbm [shape: f32[1,32], index: 16, kind: input, shape index: {}]   ;;  %s3049_s17 = inlined_call_operand.hbm [shape: f32[1,32], index: 17, kind: input, shape index: {}]   ;;  %s3050_s18 = inlined_call_operand.vmem [shape: bf16[32,128], index: 18, kind: input, shape index: {}]   ;;  %s3051_s19 = inlined_call_operand.vmem [shape: f32[1,128], index: 19, kind: input, shape index: {}]   ;;  %s3052_s20 = inlined_call_operand.hbm [shape: f32[2,128], index: 20, kind: output, shape index: {}]  }
   0x1   :  { %3060 = sst [smem:[#allocation38_spill]] %s3032_s0 }
   0x2   :  { %3061 = sst [smem:[#allocation39_spill]] %s3033_s1 }
   0x3   :  { %3062 = sst [smem:[#allocation40_spill]] %s3034_s2 }
   0x4   :  { %3063 = sst [smem:[#allocation41_spill]] %s3035_s3 }
   0x5   :  { %3064 = sst [smem:[#allocation42_spill]] %s3036_s4 }
   0x6   :  { %3065 = sst [smem:[#allocation43_spill]] %s3037_s5 }
   0x7   :  { %3066 = sst [smem:[#allocation44_spill]] %s3038_s6 }
   0x8   :  { %3067 = sst [smem:[#allocation45_spill]] %s3039_s7 }
   0x9   :  { %3068 = sst [smem:[#allocation46_spill]] %s3040_s8 }
   0xa   :  { %3069 = sst [smem:[#allocation47_spill]] %s3041_s9 }
   0xb   :  { %3070 = sst [smem:[#allocation48_spill]] %s3042_s10 }
   0xc   :  { %3071 = sst [smem:[#allocation49_spill]] %s3043_s11 }
   0xd   :  { %3072 = sst [smem:[#allocation50_spill]] %s3044_s12 }
   0xe   :  { %3073 = sst [smem:[#allocation51_spill]] %s3046_s14 }
   0xf   :  { %3074 = sst [smem:[#allocation52_spill]] %s3050_s18 }
  0x10   :  { %3075 = sst [smem:[#allocation53_spill]] %s3051_s19 }
  0x11   :  { %3076 = sst [smem:[#allocation54_spill]] %s3052_s20 }
  0x12   :  { %25 = vsyncpa [#allocation5], 0 }
  0x13   :  { %27 = vsyncpa [#allocation5 + $0x1], 0 }
  0x14   :  { %28 = vsyncpa [#allocation8], 0 }
  0x15   :  { %30 = vsyncpa [#allocation8 + $0x1], 0 }
  0x16   :  { %31 = vsyncpa [#allocation11], 0 }
  0x17   :  { %32 = vsyncpa [#allocation14], 0 }
  0x18   :  { %33 = vsyncpa [#allocation17], 0 }
  0x19   :  { %34 = vsyncpa [#allocation20], 0 }
  0x1a   :  { %35 = vsyncpa [#allocation23], 0 }
  0x1b   :  { %36 = vsyncpa [#allocation26], 0 }
  0x1c   :  { %37 = vsyncpa [#allocation6], 0  ;;  %s2717_s1 = smov 0   ;;  %s2719_s22 = smov 0  }
  0x1d   :  { %s2721_s23 = smov 0   ;;  %s2723_s24 = smov 0  }
  0x1e LB: > { %s3077_s3 = sld [smem:[#allocation40_spill]]  ;;  %s2741_s27 = sadd.s32 4294967295, %s2571_s24   ;;  %s2571_s24 = sphi %s2723_s24, %s3103_s24   ;;  %s2567_s23 = sphi %s2721_s23, %s3102_s23   ;;  %s2563_s22 = sphi %s2719_s22, %s3101_s22   ;;  %s2559_s1 = sphi %s2717_s1, %s3100_s1  }
  0x1f   : > { %p1686_p0 = scmp.ge.s32.totalorder %s2571_s24, 1  ;;  %p64_p1 = scmp.eq.s32.totalorder %s2741_s27, 0 }
  0x20   : > { %p499_p2 = scmp.lt.s32.totalorder %s2571_s24, 9  ;;  %p1687_p3 = scmp.ne.s32.totalorder %s2741_s27, 0 }
  0x21   : > { %s2581_s4 = smov [#allocation9]   ;;  %s3079_s21 = sld [smem:[#allocation41_spill]] }
  0x22   : > { %p2747_p4 = pnand %p1686_p0, %p499_p2  ;;  %s512_s29 = sshll.u32 %s2581_s4, 4  ;;  %s513_s29 = int_to_ptr.vmem [resolvable:$true] %s512_s29 }
  0x23   : > { %s3081_s5 = sld [smem:[#allocation43_spill]]  ;;  %s2582_s19 = smov [#allocation10]  }
  0x24   : > { %s510_s26 = sshll.u32 %s3077_s3, 4  ;;  %p1858_p5 = pneg %p2747_p4  ;;  %s511_s26 = int_to_ptr.hbm [resolvable:$true] %s510_s26 }
  0x25   : > { %s527_s18 = sshll.u32 %s2582_s19, 4  ;;  %s2583_s14 = smov 64   ;;  %s528_s18 = int_to_ptr.vmem [resolvable:$true] %s527_s18 }
  0x26   : > { %p2758_p6 = pnand %p1858_p5, %p64_p1  ;;  %s2584_s12 = smov 4  }
  0x27   : > { %s525_s2 = sshll.u32 %s3079_s21, 4  ;;  %s3082_s9 = sld [smem:[#allocation47_spill]]  ;;  %s526_s2 = int_to_ptr.hbm [resolvable:$true] %s525_s2 }
  0x28   : > { %1861 = dma.hbm_to_vmem [thread:$0]  (!%p2758_p6), %s511_s26, 128, %s513_s29, [#allocation8], %s2583_s14, %s2583_s14, %s2584_s12  }
  0x29   : > { %s549_s4 = sshll.u32 %s3081_s5, 4  ;;  %s2585_s8 = smov [#allocation13]   ;;  %s550_s4 = int_to_ptr.hbm [resolvable:$true] %s549_s4 }
  0x2a   : > { %1864 = dma.hbm_to_vmem [thread:$0]  (!%p2758_p6), %s526_s2, 16, %s528_s18, [#allocation11]  }
  0x2b   : > { %s551_s6 = sshll.u32 %s2585_s8, 4  ;;  %s2586_s19 = smov [#allocation16]   ;;  %s552_s6 = int_to_ptr.vmem [resolvable:$true] %s551_s6 }
  0x2c   : > { %1870 = dma.hbm_to_vmem [thread:$0]  (!%p2758_p6), %s550_s4, 16, %s552_s6, [#allocation14]  }
  0x2d   : > { %s579_s21 = sshll.u32 %s3082_s9, 4  ;;  %s581_s20 = sshll.u32 %s2586_s19, 4  ;;  %s580_s21 = int_to_ptr.hbm [resolvable:$true] %s579_s21  ;;  %s582_s20 = int_to_ptr.vmem [resolvable:$true] %s581_s20 }
  0x2e   : > { %s3083_s11 = sld [smem:[#allocation49_spill]]  ;;  %s633_s26 = sshll.u32 %s3047_s15, 4  ;;  %s634_s26 = int_to_ptr.hbm [resolvable:$true] %s633_s26 }
  0x2f   : > { %1876 = dma.hbm_to_vmem [thread:$0]  (!%p2758_p6), %s580_s21, 16, %s582_s20, [#allocation17]  }
  0x30   : > { %s2587_s8 = smov [#allocation19]   ;;  %s2588_s6 = smov [#allocation22]  }
  0x31   : > { %s605_s29 = sshll.u32 %s2587_s8, 4  ;;  %s635_s2 = sshll.u32 %s2588_s6, 4  ;;  %s606_s29 = int_to_ptr.vmem [resolvable:$true] %s605_s29  ;;  %s636_s2 = int_to_ptr.vmem [resolvable:$true] %s635_s2 }
  0x32   : > { %s3084_s30 = sld [smem:[#allocation42_spill]]  ;;  %s2589_s3 = smov [#allocation12]  }
  0x33   : > { %1888 = dma.hbm_to_vmem [thread:$0]  (!%p2758_p6), %s634_s26, 16, %s636_s2, [#allocation23]  }
  0x34   : > { %s603_s12 = sshll.u32 %s3083_s11, 4  ;;  %s3085_s7 = sld [smem:[#allocation45_spill]]  ;;  %s604_s12 = int_to_ptr.hbm [resolvable:$true] %s603_s12 }
  0x35   : > { %1882 = dma.hbm_to_vmem [thread:$0]  (!%p2758_p6), %s604_s12, 16, %s606_s29, [#allocation20]  }
  0x36   : > { %s539_s14 = sshll.u32 %s2589_s3, 4  ;;  %s2590_s12 = smov [#allocation15]   ;;  %s540_s14 = int_to_ptr.vmem [resolvable:$true] %s539_s14 }
  0x37   : > { %s566_s18 = sshll.u32 %s2590_s12, 4  ;;  %s3086_s10 = sld [smem:[#allocation48_spill]]  ;;  %s567_s18 = int_to_ptr.vmem [resolvable:$true] %s566_s18 }
  0x38   : > { %s537_s0 = sshll.u32 %s3084_s30, 4  ;;  %s618_s5 = sshll.u32 %s3045_s13, 4  ;;  %s538_s0 = int_to_ptr.hbm [resolvable:$true] %s537_s0  ;;  %s619_s5 = int_to_ptr.hbm [resolvable:$true] %s618_s5 }
  0x39   : > { %1867 = dma.hbm_to_vmem [thread:$0]  (!%p2758_p6), %s538_s0, 16, %s540_s14, [#allocation11]  }
  0x3a   : > { %s564_s20 = sshll.u32 %s3085_s7, 4  ;;  %s2591_s4 = smov [#allocation18]   ;;  %s565_s20 = int_to_ptr.hbm [resolvable:$true] %s564_s20 }
  0x3b   : > { %1873 = dma.hbm_to_vmem [thread:$0]  (!%p2758_p6), %s565_s20, 16, %s567_s18, [#allocation14]  }
  0x3c   : > { %s593_s30 = sshll.u32 %s2591_s4, 4  ;;  %s2592_s0 = smov [#allocation21]   ;;  %s594_s30 = int_to_ptr.vmem [resolvable:$true] %s593_s30 }
  0x3d   : > { %s591_s6 = sshll.u32 %s3086_s10, 4  ;;  %s620_s21 = sshll.u32 %s2592_s0, 4  ;;  %s592_s6 = int_to_ptr.hbm [resolvable:$true] %s591_s6  ;;  %s621_s21 = int_to_ptr.vmem [resolvable:$true] %s620_s21 }
  0x3e   : > { %1879 = dma.hbm_to_vmem [thread:$0]  (!%p2758_p6), %s592_s6, 16, %s594_s30, [#allocation17]  }
  0x3f   : > { %s645_s20 = sshll.u32 %s3048_s16, 4  ;;  %s657_s18 = sshll.u32 %s3049_s17, 4  ;;  %s646_s20 = int_to_ptr.hbm [resolvable:$true] %s645_s20  ;;  %s658_s18 = int_to_ptr.hbm [resolvable:$true] %s657_s18 }
  0x40   : > { %1885 = dma.hbm_to_vmem [thread:$0]  (!%p2758_p6), %s619_s5, 16, %s621_s21, [#allocation20]  }
  0x41   : > { %s2593_s8 = smov [#allocation24]   ;;  %s2594_s6 = smov [#allocation25]  }
  0x42   : > { %s647_s29 = sshll.u32 %s2593_s8, 4  ;;  %s659_s26 = sshll.u32 %s2594_s6, 4  ;;  %s648_s29 = int_to_ptr.vmem [resolvable:$true] %s647_s29  ;;  %s660_s26 = int_to_ptr.vmem [resolvable:$true] %s659_s26 }
  0x43   : > { %1891 = dma.hbm_to_vmem [thread:$0]  (!%p2758_p6), %s646_s20, 16, %s648_s29, [#allocation23]  }
  0x44   : > { %1894 = dma.hbm_to_vmem [thread:$0]  (!%p2758_p6), %s658_s18, 16, %s660_s26, [#allocation26]  }
  0x45   : > { %s2817_s2 = sadd.s32 1, %s2571_s24   ;;  %s50_s5 = sadd.s32 1, %s2567_s23 }
  0x46   : > { %s47_s4 = ssub.s32 %s2571_s24, %s2817_s2  ;;  %p57_p7 = scmp.ne.s32.totalorder %s2567_s23, %s2563_s22 }
  0x47   : > { %p48_p8 = scmp.eq.s32.totalorder %s47_s4, 0  ;;  %p58_p9 = scmp.eq.s32.totalorder %s2571_s24, 0 }
  0x48   : > { %p63_p10 = scmp.ne.s32.totalorder %s2563_s22, %s2559_s1  ;;  %p1914_p11 = scmp.lt.s32.totalorder %s2571_s24, 8 }
  0x49   : > { %s2829_s30 = scalar_select %p48_p8, %s2567_s23, %s50_s5  }
  0x4a   : > { %p59_p12 = por %p58_p9, %p57_p7  ;;  %p2833_p13 = por %p64_p1, %p63_p10 }
  0x4b   : > { %s676_s25 = sand.u32 1, %s2567_s23   ;;  %s3088_s3 = sld [smem:[#allocation38_spill]] }
  0x4c   : > { %s679_s12 = scalar_lea.vmem [#allocation4], %s676_s25  ;;  %p2842_p0 = pnand %p1914_p11, %p59_p12 }
  0x4d   : > { %s686_s18 = sshll.u32 %s679_s12, 4  ;;  %s693_s8 = sand.u32 1, %s2571_s24   ;;  %s687_s18 = int_to_ptr.vmem [resolvable:$true] %s686_s18 }
  0x4e   : > { %s3090_s26 = sld [smem:[#allocation39_spill]]  ;;  %s677_s4 = scalar_lea.sflag [#allocation5], %s676_s25 }
  0x4f   : > { %p2409_p5 = pneg %p2842_p0 }
  0x51   : > { %s682_s20 = scalar_lea.hbm %s3088_s3, %s2571_s24  ;;  %s2412_s12 = scalar_lea.hbm %s3088_s3, 8 }
  0x52   : > { %s684_s14 = sshll.u32 %s682_s20, 4  ;;  %s685_s14 = int_to_ptr.hbm [resolvable:$true] %s684_s14 }
  0x53   : > { %s2405_s7 = sshra.s32 %s685_s14, 4  ;;  %s2406_s7 = int_to_ptr.hbm [resolvable:$true] %s2405_s7 }
  0x54   : > { %s699_s5 = scalar_lea.hbm %s3090_s26, %s2571_s24  ;;  %s2407_s21 = scalar_lea.hbm %s2406_s7, 1 }
  0x55   : > { %p2408_p2 = scmp.ne.s32.totalorder %s2406_s7, %s2407_s21  ;;  %p2413_p8 = scmp.lt.s32.totalorder %s2406_s7, %s3088_s3 }
  0x56   : > { %p2414_p9 = scmp.lt.s32.totalorder %s2412_s12, %s2407_s21 }
  0x57   : > { %p2410_p6 = pnand %p2409_p5, %p2408_p2 }
  0x58   : > { %p2415_p10 = por %p2414_p9, %p2413_p8 }
  0x59   : > { %p2411_p7 = pneg %p2410_p6 }
  0x5b   : > { %p2416_p11 = pnand %p2415_p10, %p2411_p7 }
  0x5d   : > { %2419 = shalt.err (!%p2416_p11)
}
  0x5e   : > { %1898 = dma.hbm_to_vmem [thread:$0]  (!%p2842_p0), %s685_s14, 16, %s687_s18, %s677_s4  }
  0x5f   : > { %s701_s24 = sshll.u32 %s699_s5, 4  ;;  %s696_s29 = scalar_lea.vmem [#allocation7], %s676_s25  ;;  %s702_s24 = int_to_ptr.hbm [resolvable:$true] %s701_s24 }
  0x60   : > { %s703_s6 = sshll.u32 %s696_s29, 4  ;;  %s694_s11 = scalar_lea.sflag [#allocation8], %s693_s8  ;;  %s704_s6 = int_to_ptr.vmem [resolvable:$true] %s703_s6 }
  0x61   : > { %s2435_s19 = sshra.s32 %s702_s24, 4  ;;  %s2442_s10 = scalar_lea.hbm %s3090_s26, 8  ;;  %s2436_s19 = int_to_ptr.hbm [resolvable:$true] %s2435_s19 }
  0x62   : > { %s2437_s20 = scalar_lea.hbm %s2436_s19, 1  ;;  %p2443_p7 = scmp.lt.s32.totalorder %s2436_s19, %s3090_s26 }
  0x63   : > { %p2438_p12 = scmp.ne.s32.totalorder %s2436_s19, %s2437_s20  ;;  %p2444_p8 = scmp.lt.s32.totalorder %s2442_s10, %s2437_s20 }
  0x65   : > { %p2440_p2 = pnand %p2438_p12, %p2409_p5  ;;  %p2445_p9 = por %p2444_p8, %p2443_p7 }
  0x67   : > { %p2441_p6 = pneg %p2440_p2 }
  0x69   : > { %p2446_p10 = pnand %p2445_p9, %p2441_p6 }
  0x6b   : > { %2449 = shalt.err (!%p2446_p10)
}
  0x6c   : > { %1901 = dma.hbm_to_vmem [thread:$0]  (!%p2842_p0), %s702_s24, 16, %s704_s6, %s694_s11  }
  0x6d   : > { %712 = sbr.rel (%p2747_p4) target bundleno = 2560 (0xa00), region = 100  ;;  %s2878_s25 = sand.u32 (!%p2747_p4), 1, %s2563_s22  }
  0x6e   : > { %s715_s18 = scalar_lea.sflag (!%p2747_p4), [#allocation5], %s2878_s25  ;;  %s717_s8 = scalar_lea.vmem (!%p2747_p4), [#allocation4], %s2878_s25 }
  0x72   : > { %2518 = dma.done.wait (%p2833_p13), %s715_s18, 16  }
  0x73   : > { %2520 = vsyncadd (%p2833_p13), %s715_s18, 4294967280  ;;  %s723_s11 = sand.u32 1, %s2741_s27   ;;  %s726_s28 = scalar_lea.vmem [#allocation7], %s2878_s25 }
  0x74   : > { %s724_s1 = scalar_lea.sflag [#allocation8], %s723_s11 }
  0x75   : > { %2522 = dma.done.wait (%p2833_p13), %s724_s1, 16  }
  0x76   : > { %2524 = vsyncadd (%p2833_p13), %s724_s1, 4294967280 }
  0x77   : > { %2526 = dma.done.wait (%p64_p1), [#allocation8], 128  }
  0x78   : > { %2528 = vsyncadd (%p64_p1), [#allocation8], 4294967168 }
  0x79   : > { %2530 = dma.done.wait (%p64_p1), [#allocation11], 32  }
  0x7a   : > { %2532 = vsyncadd (%p64_p1), [#allocation11], 4294967264 }
  0x7b   : > { %2534 = dma.done.wait (%p64_p1), [#allocation14], 32  }
  0x7c   : > { %2536 = vsyncadd (%p64_p1), [#allocation14], 4294967264 }
  0x7d   : > { %2538 = dma.done.wait (%p64_p1), [#allocation17], 32  }
  0x7e   : > { %2540 = vsyncadd (%p64_p1), [#allocation17], 4294967264 }
  0x7f   : > { %2542 = dma.done.wait (%p64_p1), [#allocation20], 32  }
  0x80   : > { %2544 = vsyncadd (%p64_p1), [#allocation20], 4294967264 }
  0x81   : > { %2546 = dma.done.wait (%p64_p1), [#allocation23], 32  }
  0x82   : > { %2548 = vsyncadd (%p64_p1), [#allocation23], 4294967264 }
  0x83   : > { %2550 = dma.done.wait (%p64_p1), [#allocation26], 16  }
  0x84   : > { %2552 = vsyncadd (%p64_p1), [#allocation26], 4294967280  ;;  %846 = sbr.rel (%p1687_p3) target bundleno = 139 (0x8b), region = 160 }
  0x89   : > { %vm847_vm0 = vcmask 254976   ;;  %v2595_v0 = vmov 0.0  }
  0x8a   : > { %848 = vst.msk [vmem:[#allocation3] sm:$0x3] %vm847_vm0, %v2595_v0 }
  0x8b PF: > { %v1789_v1 = vld [vmem:[#allocation9] sm:$0xff]  ;;  %v849_v2 = vld [vmem:[%s717_s8] sm:$0x1]  ;;  %vm862_vm1 = vcmask 130048   ;;  %v2008_v3 = vld [vmem:[#allocation10] ss:$0 sm:$0xff] }
  0x8c   : > { %873 = vmatpush.bf16.msra.mxu0 %v1789_v1  ;;  %v2009_v4 = vld [vmem:[%s726_s28] ss:$0 sm:$0xff]  ;;  %s2924_s0 = smov 0  }
  0x8f   : > { %1718 = vmatmul.msk.bf16.vlgmr.msra.gmra.mxu0 %vm862_vm1, %v849_v2 }
 0x10c   : > { %v875_v5 = vpop.f32.mrf.mxu0 }
 0x10d   : > { %v876_v6 = vadd.f32 %v2008_v3, %v875_v5 }
 0x10f   : > { %v883_v7 = vadd.f32 %v2009_v4, %v876_v6  }
 0x114   : > { %v877_v8 = vpop.f32.mrf.mxu0 }
 0x115 LB: >> { %vm893_vm2 = vcmask 254976   ;;  %v2596_v10 = vmov 32.0   ;;  %s3091_s12 = sld [smem:[#allocation44_spill]]  ;;  %v2010_v33 = vld [vmem:[#allocation12] ss:$0 sm:$0xff]  ;;  %vm952_vm7 = vcmask 261120   ;;  %s2579_s0 = sphi %s2924_s0, %s889_s0   ;;  %v2575_v7 = vphi %v883_v7, %v3096_v7  }
 0x116   : >> { %v894_v9 = vsel %vm893_vm2, %v2575_v7, 0.0  ;;  %2018 = vrcp.f32 %v2596_v10  ;;  %v2011_v36 = vld [vmem:[#allocation13] ss:$0 sm:$0xff]  ;;  %v2012_v40 = vld [vmem:[#allocation15] ss:$0 sm:$0xff]  ;;  %s2597_s6 = smov 112  }
 0x117   : >> { %895 = vadd.xlane.f32.xlu0 %v894_v9  ;;  %s2598_s19 = smov 120   ;;  %s2599_s20 = smov 96   ;;  %vm972_vm8 = vcmask 64512   ;;  %vm997_vm9 = vcmask 9216   ;;  %vm1018_vm10 = vcmask 1040384   ;;  %vm1014_vm11 = vcmask 15360  }
 0x118   : >> { %s2600_s7 = smov 80   ;;  %s2601_s9 = smov 88   ;;  %vm1035_vm12 = vcmask 58368   ;;  %vm1102_vm13 = vcmask 123968   ;;  %vm1169_vm14 = vcmask 189568   ;;  %vm1236_vm15 = vcmask 255168  }
 0x119   : >> { %s2602_s10 = smov 104   ;;  %s2603_s21 = smov 72  }
 0x11a   : >> { %s2604_s14 = smov 64   ;;  %s2605_s25 = smov 40  }
 0x11b   : >> { %v1791_v22 = vld [vmem:[%s3091_s12 + $0x8] sm:$0xff]  ;;  %v1790_v23 = vld [vmem:[%s3091_s12] sm:$0xff]  ;;  %s2606_s18 = smov 48   ;;  %s2607_s8 = smov 56  }
 0x11c   : >> { %v2019_v11 = vpop.eup %2018  ;;  %962 = vmatpush.bf16.msra.mxu0 %v1791_v22  ;;  %s2608_s11 = smov 16   ;;  %s2609_s1 = smov 8  }
 0x11d   : >> { %v898_v12 = vmul.f32 32.0, %v2019_v11  ;;  %vm902_vm3 = vweird.f32 %v2019_v11  ;;  %s2610_s28 = smov 24   ;;  %s3092_s24 = sld [smem:[#allocation46_spill]] }
 0x11e   : >> { %s889_s0 = sadd.s32 1, %s2579_s0  }
 0x11f   : >> { %v899_v13 = vsub.f32 1.0, %v898_v12  ;;  %p886_p1 = scmp.ge.s32.totalorder %s889_s0, 2  }
 0x120   : >> { %963 = vmatpush.bf16.msra.mxu0 %v1790_v23  ;;  %p1775_p3 = scmp.ne.s32.totalorder (%p886_p1), %s2741_s27, 7 }
 0x121   : >> { %v900_v14 = vmul.f32 %v2019_v11, %v899_v13 }
 0x123   : >> { %v901_v15 = vadd.f32 %v2019_v11, %v900_v14  ;;  %s3093_s29 = smov %s3092_s24 }
 0x125   : >> { %v2934_v16 = vsel %vm902_vm3, %v2019_v11, %v901_v15 }
 0x18a   : >> { %v896_v17 = vpop.xlane.xlu0 %895 }
 0x18b   : >> { %v904_v18 = vmul.f32 %v2934_v16, %v896_v17 }
 0x18d   : >> { %v905_v19 = vsub.f32 %v2575_v7, %v904_v18 }
 0x18f   : >> { %v906_v20 = vmul.f32 %v905_v19, %v905_v19 }
 0x191   : >> { %v907_v21 = vsel %vm893_vm2, %v906_v20, 0.0 }
 0x192   : >> { %908 = vadd.xlane.f32.xlu0 %v907_v21 }
 0x205   : >> { %v909_v24 = vpop.xlane.xlu0 %908 }
 0x206   : >> { %v910_v25 = vmul.f32 %v909_v24, %v2934_v16 }
 0x208   : >> { %v911_v26 = vadd.f32 1e-05, %v910_v25 }
 0x20a   : >> { %2020 = vrsqrt.f32 %v911_v26  ;;  %vm918_vm5 = vweird.f32 %v911_v26 }
 0x210   : >> { %v2021_v27 = vpop.eup %2020 }
 0x211   : >> { %v913_v28 = vmul.f32 %v2021_v27, %v911_v26  ;;  %vm919_vm4 = vweird.f32 %v2021_v27 }
 0x212   : >> { %vm920_vm6 = vmor %vm918_vm5, %vm919_vm4  ;;  %vm1383_vm4 = vcmask 523264  }
 0x213   : >> { %v914_v29 = vmul.f32 %v2021_v27, %v913_v28 }
 0x215   : >> { %v915_v30 = vmul.f32 0.5, %v914_v29 }
 0x217   : >> { %v916_v31 = vsub.f32 1.5, %v915_v30 }
 0x219   : >> { %v917_v32 = vmul.f32 %v2021_v27, %v916_v31 }
 0x21b   : >> { %v921_v34 = vsel %vm920_vm6, %v2021_v27, %v917_v32 }
 0x21c   : >> { %v922_v35 = vmul.f32 %v921_v34, %v905_v19 }
 0x21e   : >> { %v926_v37 = vmul.f32 %v2010_v33, %v922_v35 }
 0x220   : >> { %v930_v38 = vadd.f32 %v2011_v36, %v926_v37 }
 0x222   : >> { %v931_v39 = vpack.c.bf16 %v930_v38, %v930_v38 }
 0x224   : >> { %1727 = vmatmul.msk.bf16.vlgmr.msra.gmra.mxu0 %vm952_vm7, %v931_v39 }
 0x2a1   : >> { %v965_v41 = vpop.f32.mrf.mxu0 }
 0x2a2   : >> { %v966_v42 = vadd.f32 %v2012_v40, %v965_v41 }
 0x2a4   : >> { %1104 = vrot.lane.b32.xlu0 %v966_v42, %s2597_s6  ;;  %1037 = vrot.lane.b32.xlu2 %v966_v42, %s2598_s19  ;;  %v1010_v59 = vpack.c.bf16 %v966_v42, %v966_v42 }
 0x2a5   : >> { %970 = vrot.lane.b32.xlu1 %v966_v42, %s2599_s20 }
 0x2a9   : >> { %v967_v43 = vpop.f32.mrf.mxu0 }
 0x2ac   : >> { %1106 = vrot.lane.b32.xlu2 %v966_v42, %s2600_s7 }
 0x2ad   : >> { %1039 = vrot.lane.b32.xlu1 %v966_v42, %s2601_s9  ;;  %s3094_s9 = sld [smem:[#allocation50_spill]] }
 0x2b4   : >> { %1171 = vrot.lane.b32.xlu2 %v966_v42, %s2602_s10 }
 0x2b5   : >> { %1173 = vrot.lane.b32.xlu1 %v966_v42, %s2603_s21 }
 0x2fe   : >> { %v1038_v44 = vpop.permute.xlu2 %1037 }
 0x306   : >> { %v1107_v47 = vpop.permute.xlu2 %1106 }
 0x30e   : >> { %v1172_v50 = vpop.permute.xlu2 %1171 }
 0x316   : >> { %v1105_v49 = vpop.permute.xlu0 %1104 }
 0x317   : >> { %v971_v45 = vpop.permute.xlu1 %970 }
 0x318   : >> { %1728 = vmatpush.xpose.msk.msra.mxu1 %vm972_vm8, %v971_v45 }
 0x31b   : >> { %1729 = vmatmul.msk.f32.vlgmr.msra.gmra.mxu1 %vm972_vm8, %v966_v42 }
 0x31f   : >> { %v1040_v46 = vpop.permute.xlu1 %1039 }
 0x320   : >> { %1731 = vmatpush.xpose.msk.msra.mxu3 %vm972_vm8, %v1040_v46 }
 0x323   : >> { %1732 = vmatmul.msk.f32.vlgmr.msra.gmra.mxu3 %vm972_vm8, %v1038_v44 }
 0x324   : >> { %1734 = vmatpush.xpose.msk.msrb.mxu3 %vm972_vm8, %v1107_v47 }
 0x327   : >> { %v1174_v48 = vpop.permute.xlu1 %1173 }
 0x328   : >> { %1737 = vmatpush.xpose.msk.msra.mxu3 %vm972_vm8, %v1174_v48 }
 0x32b   : >> { %1735 = vmatmul.msk.f32.vlgmr.msrb.gmra.mxu3 %vm972_vm8, %v1105_v49 }
 0x333   : >> { %1738 = vmatmul.msk.f32.vlgmr.msra.gmra.mxu3 %vm972_vm8, %v1172_v50  ;;  %v1793_v50 = vld [vmem:[%s3092_s24 + $0x8] sm:$0xff] }
 0x398   : >> { %v994_v51 = vpop.f32.mrf.mxu1 }
 0x399   : >> { %v998_v52 = vsel %vm997_vm9, %v994_v51, -inf }
 0x39a   : >> { %999 = vmax.xlane.f32.xlu1 %v998_v52 }
 0x3a6   : >> { %v1062_v53 = vpop.f32.mrf.mxu3 }
 0x3a7   : >> { %v1065_v54 = vsel %vm997_vm9, %v1062_v53, -inf }
 0x3a8   : >> { %1066 = vmax.xlane.f32.xlu0 %v1065_v54 }
 0x3ae   : >> { %v1129_v55 = vpop.f32.mrf.mxu3 }
 0x3af   : >> { %v1132_v56 = vsel %vm997_vm9, %v1129_v55, -inf }
 0x3b0   : >> { %1133 = vmax.xlane.f32.xlu2 %v1132_v56 }
 0x3b6   : >> { %v1196_v57 = vpop.f32.mrf.mxu3 }
 0x3b7   : >> { %v1199_v58 = vsel %vm997_vm9, %v1196_v57, -inf }
 0x3b8   : >> { %1200 = vmax.xlane.f32.xlu2 %v1199_v58 }
 0x3d0   : >> { %1012 = vrot.lane.b32.xlu2 %v1010_v59, %s2604_s14 }
 0x3d8   : >> { %1211 = vrot.lane.b32.xlu2 %v1010_v59, %s2605_s25 }
 0x40d   : >> { %v1000_v60 = vpop.xlane.xlu1 %999 }
 0x40e   : >> { %v1001_v61 = vsub.f32 %v994_v51, %v1000_v60  ;;  %v1792_v51 = vld [vmem:[%s3093_s29] sm:$0xff] }
 0x410   : >> { %v1002_v62 = vmul.f32 1.442695, %v1001_v61 }
 0x412   : >> { %2022 = vpow2.f32 %v1002_v62 }
 0x418   : >> { %v2023_v63 = vpop.eup %2022 }
 0x419   : >> { %v1004_v0 = vsel %vm997_vm9, %v2023_v63, 0.0 }
 0x41a   : >> { %1005 = vadd.xlane.f32.xlu1 %v1004_v0 }
 0x41b   : >> { %v1067_v1 = vpop.xlane.xlu0 %1066 }
 0x41c   : >> { %v1068_v2 = vsub.f32 %v1062_v53, %v1067_v1 }
 0x41e   : >> { %v1069_v3 = vmul.f32 1.442695, %v1068_v2 }
 0x420   : >> { %2024 = vpow2.f32 %v1069_v3 }
 0x423   : >> { %v1134_v4 = vpop.xlane.xlu2 %1133 }
 0x424   : >> { %v1135_v5 = vsub.f32 %v1129_v55, %v1134_v4  ;;  %v1795_v4 = vld [vmem:[%s3094_s9 + $0x8] sm:$0xff] }
 0x425   : >> { %1339 = vmatpush.bf16.msrb.mxu3 %v1795_v4 }
 0x426   : >> { %v2025_v6 = vpop.eup %2024  ;;  %v1136_v8 = vmul.f32 1.442695, %v1135_v5 }
 0x427   : >> { %v1071_v9 = vsel %vm997_vm9, %v2025_v6, 0.0 }
 0x428   : >> { %2026 = vpow2.f32 %v1136_v8  ;;  %1072 = vadd.xlane.f32.xlu0 %v1071_v9 }
 0x42b   : >> { %v1201_v10 = vpop.xlane.xlu2 %1200 }
 0x42c   : >> { %v1202_v11 = vsub.f32 %v1196_v57, %v1201_v10  ;;  %v2013_v57 = vld [vmem:[#allocation16] ss:$0 sm:$0xff] }
 0x42e   : >> { %v2027_v12 = vpop.eup %2026  ;;  %v1203_v13 = vmul.f32 1.442695, %v1202_v11 }
 0x42f   : >> { %v1138_v14 = vsel %vm997_vm9, %v2027_v12, 0.0 }
 0x430   : >> { %2028 = vpow2.f32 %v1203_v13  ;;  %1139 = vadd.xlane.f32.xlu1 %v1138_v14 }
 0x433   : >> { %v1013_v15 = vpop.permute.xlu2 %1012 }
 0x434   : >> { %v1020_v17 = vsel %vm1018_vm10, %v1013_v15, 0 }
 0x435   : >> { %1029 = vmatpush.bf16.msra.mxu2 %v1020_v17 }
 0x436   : >> { %v2029_v18 = vpop.eup %2028 }
 0x437   : >> { %v1205_v19 = vsel %vm997_vm9, %v2029_v18, 0.0 }
 0x438   : >> { %1206 = vadd.xlane.f32.xlu1 %v1205_v19  ;;  %v2014_v19 = vld [vmem:[#allocation18] ss:$0 sm:$0xff] }
 0x43b   : >> { %v1212_v20 = vpop.permute.xlu2 %1211 }
 0x43c   : >> { %1144 = vrot.lane.b32.xlu0 %v1010_v59, %s2606_s18  ;;  %v1217_v21 = vsel %vm1018_vm10, %v1212_v20, 0  ;;  %s3095_s18 = sld [smem:[#allocation51_spill]] }
 0x43d   : >> { %1226 = vmatpush.bf16.msrb.mxu0 %v1217_v21 }
 0x442   : >> { %v1799_v5 = vld [vmem:[%s3095_s18 + $0x18] sm:$0xff]  ;;  %v1798_v9 = vld [vmem:[%s3095_s18 + $0x10] sm:$0xff]  ;;  %v1797_v11 = vld [vmem:[%s3095_s18 + $0x8] sm:$0xff] }
 0x451   : >> { %1077 = vrot.lane.b32.xlu1 %v1010_v59, %s2607_s8 }
 0x48d   : >> { %v1006_v22 = vpop.xlane.xlu1 %1005 }
 0x48e   : >> { %2030 = vrcp.f32 %v1006_v22  ;;  %v2015_v22 = vld [vmem:[#allocation19] ss:$0 sm:$0xff] }
 0x494   : >> { %v2031_v23 = vpop.eup %2030 }
 0x495   : >> { %v1008_v24 = vmul.f32 %v2031_v23, %v2023_v63 }
 0x497   : >> { %v1009_v25 = vpack.c.bf16 %v1008_v24, %v1008_v24 }
 0x499   : >> { %1730 = vmatmul.msk.bf16.vlgmr.msra.gmra.mxu2 %vm1014_vm11, %v1009_v25 }
 0x49b   : >> { %v1073_v27 = vpop.xlane.xlu0 %1072 }
 0x4a3   : >> { %v1140_v26 = vpop.xlane.xlu1 %1139 }
 0x4a4   : >> { %2032 = vrcp.f32 %v1140_v26  ;;  %v1796_v26 = vld [vmem:[%s3095_s18] sm:$0xff] }
 0x4aa   : >> { %v2033_v28 = vpop.eup %2032 }
 0x4ab   : >> { %v1207_v29 = vpop.xlane.xlu1 %1206  ;;  %v1142_v30 = vmul.f32 %v2033_v28, %v2027_v12 }
 0x4ac   : >> { %2034 = vrcp.f32 %v1207_v29 }
 0x4ad   : >> { %v1143_v33 = vpack.c.bf16 %v1142_v30, %v1142_v30  ;;  %2036 = vrcp.f32 %v1073_v27  ;;  %v2016_v27 = vld [vmem:[#allocation21] ss:$0 sm:$0xff] }
 0x4ae   : >> { %v1145_v31 = vpop.permute.xlu0 %1144 }
 0x4af   : >> { %v1150_v32 = vsel %vm1018_vm10, %v1145_v31, 0 }
 0x4b0   : >> { %1159 = vmatpush.bf16.msrb.mxu2 %v1150_v32  ;;  %v2017_v32 = vld [vmem:[#allocation22] ss:$0 sm:$0xff] }
 0x4b2   : >> { %v2035_v34 = vpop.eup %2034 }
 0x4b3   : >> { %v1209_v35 = vmul.f32 %v2035_v34, %v2029_v18  ;;  %1736 = vmatmul.msk.bf16.vlgmr.msrb.gmra.mxu2 %vm1014_vm11, %v1143_v33  ;;  %v2037_v37 = vpop.eup %2036 }
 0x4b4   : >> { %v1075_v38 = vmul.f32 %v2037_v37, %v2025_v6  ;;  %1391 = vmatpush.bf16.msra.mxu2 %v1799_v5 }
 0x4b5   : >> { %v1210_v36 = vpack.c.bf16 %v1209_v35, %v1209_v35 }
 0x4b6   : >> { %v1076_v41 = vpack.c.bf16 %v1075_v38, %v1075_v38 }
 0x4b7   : >> { %1739 = vmatmul.msk.bf16.vlgmr.msrb.gmra.mxu0 %vm1014_vm11, %v1210_v36 }
 0x4b8   : >> { %1392 = vmatpush.bf16.msra.mxu2 %v1798_v9 }
 0x4bc   : >> { %1393 = vmatpush.bf16.msra.mxu2 %v1797_v11 }
 0x4c0   : >> { %1394 = vmatpush.bf16.msra.mxu2 %v1796_v26 }
 0x4c3   : >> { %v1078_v39 = vpop.permute.xlu1 %1077 }
 0x4c4   : >> { %v1083_v40 = vsel %vm1018_vm10, %v1078_v39, 0 }
 0x4c5   : >> { %1092 = vmatpush.bf16.msrb.mxu1 %v1083_v40 }
 0x4c8   : >> { %1733 = vmatmul.msk.bf16.vlgmr.msrb.gmra.mxu1 %vm1014_vm11, %v1076_v41 }
 0x4c9   : >> { %1269 = vmatpush.bf16.msra.mxu1 %v1793_v50 }
 0x4cd   : >> { %1270 = vmatpush.bf16.msra.mxu1 %v1792_v51 }
 0x51c   : >> { %v1031_v42 = vpop.f32.mrf.mxu2 }
 0x51d   : >> { %1036 = vst.msk [vmem:[#allocation2] sm:$0x3] %vm1035_vm12, %v1031_v42 }
 0x524   : >> { %v1033_v43 = vpop.f32.mrf.mxu2 }
 0x534   : >> { %v1228_v44 = vpop.f32.mrf.mxu0 }
 0x536   : >> { %v1161_v45 = vpop.f32.mrf.mxu2 }
 0x537   : >> { %1166 = vrot.lane.b32.xlu0 %v1161_v45, %s2608_s11 }
 0x53c   : >> { %v1230_v46 = vpop.f32.mrf.mxu0 }
 0x53e   : >> { %v1163_v47 = vpop.f32.mrf.mxu2 }
 0x545   : >> { %v1094_v48 = vpop.f32.mrf.mxu1 }
 0x546   : >> { %1099 = vrot.lane.b32.xlu2 %v1094_v48, %s2609_s1 }
 0x54d   : >> { %v1096_v49 = vpop.f32.mrf.mxu1 }
 0x54e   : >> { %1233 = vrot.lane.b32.xlu2 %v1228_v44, %s2610_s28 }
 0x5a0   : >> { %v1100_v52 = vpop.permute.xlu2 %1099 }
 0x5a1   : >> { %1103 = vst.msk [vmem:[#allocation2] sm:$0x3] %vm1102_vm13, %v1100_v52  ;;  %v2040_v52 = vld [vmem:[#allocation24] ss:$0 sm:$0xff] (%p886_p1) }
 0x5a8   : >> { %v1234_v54 = vpop.permute.xlu2 %1233 }
 0x5a9   : >> { %v1167_v53 = vpop.permute.xlu0 %1166 }
 0x5aa   : >> { %1170 = vst.msk [vmem:[#allocation2] sm:$0x3] %vm1169_vm14, %v1167_v53 }
 0x5ab   : >> { %1237 = vst.msk [vmem:[#allocation2] sm:$0x3] %vm1236_vm15, %v1234_v54 }
 0x5b2   : >> { %v1238_v55 = vld [vmem:[#allocation2] sm:$0x3] }
 0x5b3   : >> { %v1239_v56 = vpack.c.bf16 %v1238_v55, %v1238_v55  ;;  %v2041_v55 = vld [vmem:[#allocation25] ss:$0 sm:$0xff] (%p886_p1) }
 0x5b5   : >> { %1748 = vmatmul.msk.bf16.vlgmr.msra.gmra.mxu1 %vm952_vm7, %v1239_v56 }
 0x632   : >> { %v1272_v58 = vpop.f32.mrf.mxu1 }
 0x633   : >> { %v1273_v59 = vadd.f32 %v2013_v57, %v1272_v58  ;;  %v1401_v57 = vld [vmem:[#allocation3] sm:$0x3] (%p886_p1) }
 0x635   : >> { %v1276_v60 = vadd.f32 %v2575_v7, %v1273_v59  ;;  %v1794_v7 = vld [vmem:[%s3094_s9] sm:$0xff] }
 0x636   : >> { %1340 = vmatpush.bf16.msrb.mxu3 %v1794_v7 }
 0x637   : >> { %v1279_v61 = vsel %vm893_vm2, %v1276_v60, 0.0 }
 0x638   : >> { %1280 = vadd.xlane.f32.xlu0 %v1279_v61 }
 0x63a   : >> { %v1274_v62 = vpop.f32.mrf.mxu1 }
 0x6ab   : >> { %v1281_v63 = vpop.xlane.xlu0 %1280 }
 0x6ac   : >> { %v1282_v0 = vmul.f32 %v1281_v63, %v2934_v16 }
 0x6ae   : >> { %v1283_v1 = vsub.f32 %v1276_v60, %v1282_v0 }
 0x6b0   : >> { %v1284_v2 = vmul.f32 %v1283_v1, %v1283_v1 }
 0x6b2   : >> { %v1285_v3 = vsel %vm893_vm2, %v1284_v2, 0.0 }
 0x6b3   : >> { %1286 = vadd.xlane.f32.xlu1 %v1285_v3 }
 0x726   : >> { %v1287_v6 = vpop.xlane.xlu1 %1286 }
 0x727   : >> { %v1288_v8 = vmul.f32 %v1287_v6, %v2934_v16 }
 0x729   : >> { %v1289_v10 = vadd.f32 1e-05, %v1288_v8 }
 0x72b   : >> { %2038 = vrsqrt.f32 %v1289_v10  ;;  %vm1296_vm1 = vweird.f32 %v1289_v10 }
 0x731   : >> { %v2039_v12 = vpop.eup %2038 }
 0x732   : >> { %v1291_v13 = vmul.f32 %v2039_v12, %v1289_v10  ;;  %vm1297_vm0 = vweird.f32 %v2039_v12 }
 0x733   : >> { %vm1298_vm3 = vmor %vm1296_vm1, %vm1297_vm0 }
 0x734   : >> { %v1292_v14 = vmul.f32 %v2039_v12, %v1291_v13 }
 0x736   : >> { %v1293_v15 = vmul.f32 0.5, %v1292_v14 }
 0x738   : >> { %v1294_v17 = vsub.f32 1.5, %v1293_v15 }
 0x73a   : >> { %v1295_v18 = vmul.f32 %v2039_v12, %v1294_v17 }
 0x73c   : >> { %v1299_v20 = vsel %vm1298_vm3, %v2039_v12, %v1295_v18 }
 0x73d   : >> { %v1300_v21 = vmul.f32 %v1299_v20, %v1283_v1 }
 0x73f   : >> { %v1304_v23 = vmul.f32 %v2014_v19, %v1300_v21 }
 0x741   : >> { %v1308_v24 = vadd.f32 %v2015_v22, %v1304_v23 }
 0x743   : >> { %v1309_v25 = vpack.c.bf16 %v1308_v24, %v1308_v24 }
 0x745   : >> { %1757 = vmatmul.msk.bf16.vlgmr.msrb.gmra.mxu3 %vm952_vm7, %v1309_v25 }
 0x7c8   : >> { %v1342_v28 = vpop.f32.mrf.mxu3 }
 0x7c9   : >> { %v1343_v29 = vadd.f32 %v2016_v27, %v1342_v28 }
 0x7cb   : >> { %v1346_v30 = vpack.c.bf16 %v1343_v29, %v1343_v29 }
 0x7cd   : >> { %1774 = vmatmul.msk.bf16.vlgmr.msra.gmra.mxu2 %vm1383_vm4, %v1346_v30 }
 0x7d0   : >> { %v1344_v31 = vpop.f32.mrf.mxu3 }
 0x850   : >> { %v1396_v33 = vpop.f32.mrf.mxu2 }
 0x851   : >> { %v1397_v34 = vadd.f32 %v2017_v32, %v1396_v33 }
 0x853   : >> { %v1400_v35 = vadd.f32 %v1397_v34, %v1276_v60  }
 0x854   : > { %888 = sbr.rel (!%p886_p1) target bundleno = 277 (0x115), region = 213 }
 0x855   : >> { %v3096_v7 = vmov %v1400_v35  ;;  %v1405_v37 = vsel (%p886_p1), %vm893_vm2, %v1400_v35, 0.0 }
 0x856   : > { %1406 = vadd.xlane.f32.xlu0 (%p886_p1), %v1405_v37 }
 0x858   : >> { %v1398_v36 = vpop.f32.mrf.mxu2 }
 0x859   : > { %s3097_s6 = sld [smem:[#allocation52_spill]] (!%p1775_p3) }
 0x85a   : > { %s3098_s21 = sld [smem:[#allocation53_spill]] (!%p1775_p3) }
 0x8c9   : > { %v1407_v38 = vpop.xlane.xlu0 %1406 }
 0x8ca   : > { %v1415_v39 = vmul.f32 %v1407_v38, %v2934_v16 }
 0x8cc   : > { %v1416_v40 = vsub.f32 %v1400_v35, %v1415_v39 }
 0x8ce   : > { %v1417_v41 = vmul.f32 %v1416_v40, %v1416_v40 }
 0x8d0   : > { %v1418_v42 = vsel %vm893_vm2, %v1417_v41, 0.0 }
 0x8d1   : > { %1419 = vadd.xlane.f32.xlu0 %v1418_v42 }
 0x944   : > { %v1420_v43 = vpop.xlane.xlu0 %1419 }
 0x945   : > { %v1421_v44 = vmul.f32 %v1420_v43, %v2934_v16 }
 0x947   : > { %v1422_v45 = vadd.f32 1e-05, %v1421_v44 }
 0x949   : > { %2042 = vrsqrt.f32 %v1422_v45  ;;  %vm1429_vm6 = vweird.f32 %v1422_v45 }
 0x94f   : > { %v2043_v46 = vpop.eup %2042 }
 0x950   : > { %v1424_v47 = vmul.f32 %v2043_v46, %v1422_v45  ;;  %vm1430_vm5 = vweird.f32 %v2043_v46 }
 0x951   : > { %vm1431_vm8 = vmor %vm1429_vm6, %vm1430_vm5 }
 0x952   : > { %v1425_v48 = vmul.f32 %v2043_v46, %v1424_v47 }
 0x954   : > { %v1426_v49 = vmul.f32 0.5, %v1425_v48 }
 0x956   : > { %v1427_v50 = vsub.f32 1.5, %v1426_v49 }
 0x958   : > { %v1428_v51 = vmul.f32 %v2043_v46, %v1427_v50 }
 0x95a   : > { %v1432_v53 = vsel %vm1431_vm8, %v2043_v46, %v1428_v51 }
 0x95b   : > { %v1433_v54 = vmul.f32 %v1432_v53, %v1416_v40 }
 0x95d   : > { %v1437_v56 = vmul.f32 %v2040_v52, %v1433_v54 }
 0x95f   : > { %v1441_v58 = vadd.f32 %v2041_v55, %v1437_v56  ;;  %1447 = sbr.rel (%p1775_p3) target bundleno = 2549 (0x9f5), region = 171 }
 0x961   : > { %v1442_v59 = vadd.f32 %v1441_v58, %v1401_v57 }
 0x963   : > { %1443 = vst.msk [vmem:[#allocation3] sm:$0x3] %vm893_vm2, %v1442_v59 }
 0x964   : > { %v1801_v16 = vld [vmem:[%s3097_s6 + $0x8] sm:$0xff]  ;;  %v1800_v62 = vld [vmem:[%s3097_s6] sm:$0xff] }
 0x965   : > { %1481 = vmatpush.bf16.msra.mxu0 %v1801_v16  ;;  %v2044_v0 = vld [vmem:[%s3098_s21] ss:$0 sm:$0xff] }
 0x969   : > { %1482 = vmatpush.bf16.msra.mxu0 %v1800_v62 }
 0x96a   : > { %v1448_v60 = vld [vmem:[#allocation3] sm:$0x3] }
 0x96b   : > { %v1449_v61 = vmul.f32 0.125, %v1448_v60 }
 0x96d   : > { %v1450_v63 = vpack.c.bf16 %v1449_v61, %v1449_v61 }
 0x96f   : > { %1784 = vmatmul.msk.bf16.vlgmr.msra.gmra.mxu0 %vm952_vm7, %v1450_v63 }
 0x9ec   : > { %v1484_v1 = vpop.f32.mrf.mxu0 }
 0x9ed   : > { %v1485_v2 = vadd.f32 %v2044_v0, %v1484_v1 }
 0x9ef   : > { %1488 = vst [vmem:[#allocation27] sm:$0x3] %v1485_v2 }
 0x9f4   : > { %v1486_v3 = vpop.f32.mrf.mxu0 }
 0x9f5 PF: > { %p1927_p4 = scmp.eq.s32.totalorder %s2741_s27, 7  ;;  %s2611_s14 = smov [#allocation27]  }
 0x9f6   : > { %s1495_s25 = sshll.u32 %s2611_s14, 4  ;;  %s3099_s1 = sld [smem:[#allocation54_spill]]  ;;  %s1496_s25 = int_to_ptr.vmem [resolvable:$true] %s1495_s25 }
 0x9fc   : > { %s1497_s28 = sshll.u32 %s3099_s1, 4  ;;  %s1498_s28 = int_to_ptr.hbm [resolvable:$true] %s1497_s28 }
 0x9fd   : > { %1855 = dma.vmem_to_hbm [thread:$0]  (%p1927_p4), %s1496_s25, 32, %s1498_s28, [#allocation6]  }
 0x9fe   : > { %2554 = dma.done.wait (%p1927_p4), [#allocation6], 32  }
 0x9ff   : > { %2556 = vsyncadd (%p1927_p4), [#allocation6], 4294967264 }
 0xa00 PF: > { %p40_p13 = scmp.ge.s32.totalorder %s2817_s2, 10   ;;  %s3100_s1 = smov %s2563_s22 }
 0xa01   : > { %s3101_s22 = smov %s2567_s23  ;;  %s3102_s23 = smov %s2829_s30 }
 0xa02   : > { %s3103_s24 = smov %s2817_s2  ;;  %42 = sbr.rel (!%p40_p13) target bundleno = 30 (0x1e), region = 224 }
 0xa07   :  { %1511 = vsyncpa [#allocation5], 1 }
 0xa08   :  { %1513 = vsyncpa [#allocation5 + $0x1], 1 }
 0xa09   :  { %1514 = vsyncpa [#allocation8], 1 }
 0xa0a   :  { %1516 = vsyncpa [#allocation8 + $0x1], 1 }
 0xa0b   :  { %1517 = vsyncpa [#allocation11], 1 }
 0xa0c   :  { %1518 = vsyncpa [#allocation14], 1 }
 0xa0d   :  { %1519 = vsyncpa [#allocation17], 1 }
 0xa0e   :  { %1520 = vsyncpa [#allocation20], 1 }
 0xa0f   :  { %1521 = vsyncpa [#allocation23], 1 }
 0xa10   :  { %1522 = vsyncpa [#allocation26], 1 }
 0xa11   :  { %1523 = vsyncpa [#allocation6], 1 }
 0xa12   :  { %1525 = vsyncpa [#allocation6 + $0x1], 1 }

</bundles_post_ra>
